<compile_context>
chip_gen: v7x
topology: tpu7x:2x2x1
jax: 0.10.0
libtpu: 0.0.40
codegen_flags: <defaults>
</compile_context>

<pallas_src>
import functools

import jax
import jax.numpy as jnp
from jax import lax
from jax.experimental import pallas as pl
from jax.experimental.pallas import tpu as pltpu


# ----------------------------------------------------------------------------
# In-kernel building blocks.
# Activation layout: (C, H*W) — channels on sublanes, flattened row-major
# spatial index p = h*W + w on the 128-lane axis.
# ----------------------------------------------------------------------------
def _conv3x3_relu(x, w_k, b, H, W):
    """3x3 same-padding conv + bias + ReLU as a single MXU matmul.

    x   : (Cin, H*W)     float32
    w_k : (Cout, 9*Cin)  row index = (3*kh + kw)*Cin + cin   (kh,kw in 0..2)
    b   : (Cout, 1)
    ->  : (Cout, H*W)
    """
    Cin, HW = x.shape
    P = W + 1                                   # covers flat shifts in [-(W+1), W+1]
    zpad = jnp.zeros((Cin, P), x.dtype)
    xp = jnp.concatenate([zpad, x, zpad], axis=1)            # (Cin, HW + 2P)
    ww = lax.broadcasted_iota(jnp.int32, (1, HW), 1) % W     # column index per pixel

    taps = []
    for dy in (-1, 0, 1):
        for dx in (-1, 0, 1):
            s = dy * W + dx
            t = lax.slice_in_dim(xp, P + s, P + s + HW, axis=1)   # (Cin, HW)
            # Row (h) overflow lands in the zero padding automatically; only the
            # column (w) wrap-around across row boundaries must be masked.
            if dx == -1:
                t = jnp.where(ww >= 1, t, 0.0)
            elif dx == 1:
                t = jnp.where(ww <= W - 2, t, 0.0)
            taps.append(t)

    patches = jnp.concatenate(taps, axis=0)                   # (9*Cin, HW)
    acc = jnp.dot(w_k, patches, preferred_element_type=jnp.float32)   # (Cout, HW)
    return jnp.maximum(acc + b, 0.0)


def _maxpool2x2(x, sel, W):
    """2x2 max-pool (stride 2) on a flat (C, H*W) map -> (C, (H//2)*(W//2)).

    x   : (C, H*W)  non-negative (post-ReLU) activations
    sel : (H*W, Q)  one-hot 0/1 selection of the 2x2 window anchors (precomputed)
    """
    C, HW = x.shape
    pad = jnp.zeros((C, W + 1), x.dtype)
    xp = jnp.concatenate([x, pad], axis=1)                    # (C, HW + W + 1)
    t01 = lax.slice_in_dim(xp, 1, 1 + HW, axis=1)             # shift by (0, +1)
    t10 = lax.slice_in_dim(xp, W, W + HW, axis=1)             # shift by (+1, 0)
    t11 = lax.slice_in_dim(xp, W + 1, W + 1 + HW, axis=1)     # shift by (+1, +1)
    m = jnp.maximum(jnp.maximum(x, t01), jnp.maximum(t10, t11))   # (C, HW)
    # Kept anchors p = 2*h2*W + 2*w2 never read the padding; other positions are
    # discarded by the one-hot select below (exact 0/1 weights).
    return jnp.dot(m, sel, preferred_element_type=jnp.float32)     # (C, Q)


def _encoder_kernel(x_ref, w1_ref, b1_ref, s1_ref, w2_ref, b2_ref, s2_ref,
                    w3_ref, b3_ref, o_ref, *, H, W):
    """Fused encoder for one batch element.

    x_ref : (1, Cin, H*W)      o_ref : (1, 8, (H//4)*(W//4))
    w*_ref: (Cout, 9*Cin)      b*_ref: (Cout, 1)
    s*_ref: pooling one-hot select matrices
    """
    x = x_ref[0]                                                       # (Cin, H*W)
    a = _conv3x3_relu(x, w1_ref[...], b1_ref[...], H, W)               # (32, H*W)
    a = _maxpool2x2(a, s1_ref[...], W)                                 # (32, HW/4)
    a = _conv3x3_relu(a, w2_ref[...], b2_ref[...], H // 2, W // 2)     # (16, HW/4)
    a = _maxpool2x2(a, s2_ref[...], W // 2)                            # (16, HW/16)
    a = _conv3x3_relu(a, w3_ref[...], b3_ref[...], H // 4, W // 4)     # (8,  HW/16)
    o_ref[0] = a.astype(o_ref.dtype)


# ----------------------------------------------------------------------------
# pallas_call wrapper (NCHW in / NCHW out; only reshapes at the boundary).
# ----------------------------------------------------------------------------
def _replicated_spec(shape):
    return pl.BlockSpec(shape, lambda n: (0,) * len(shape))


def _prep_weight(w):
    """(Cout, Cin, 3, 3) PyTorch layout -> (Cout, 9*Cin), row = (3*kh+kw)*Cin + cin."""
    cout, cin = w.shape[0], w.shape[1]
    return jnp.transpose(w, (0, 2, 3, 1)).reshape(cout, 9 * cin)


def _pool_select(H, W):
    """(H*W, (H//2)*(W//2)) one-hot selection of 2x2 window anchors (exact 0/1)."""
    H2, W2 = H // 2, W // 2
    HW, Q = H * W, H2 * W2
    p = jnp.arange(HW, dtype=jnp.int32)[:, None]
    q = jnp.arange(Q, dtype=jnp.int32)[None, :]
    anchor = 2 * (q // W2) * W + 2 * (q % W2)
    return (p == anchor).astype(jnp.float32)


@jax.jit
def optical_damage_compress(x_nchw, params):
    """Forward pass of OpticalDamageCompress.

    x_nchw: (N, nchannels, RPIX, CPIX) float32.
    Returns compressed code in NCHW: (N, 8, RPIX//4, CPIX//4).
    """
    N, Cin, H, W = x_nchw.shape
    x_flat = x_nchw.reshape(N, Cin, H * W)          # channels->sublanes, HW->lanes

    w1 = _prep_weight(params["w1"]); b1 = params["b1"].reshape(-1, 1)
    w2 = _prep_weight(params["w2"]); b2 = params["b2"].reshape(-1, 1)
    w3 = _prep_weight(params["w3"]); b3 = params["b3"].reshape(-1, 1)
    s1 = _pool_select(H, W)
    s2 = _pool_select(H // 2, W // 2)
    C3 = w3.shape[0]
    Ho, Wo = H // 4, W // 4

    kernel = functools.partial(_encoder_kernel, H=H, W=W)

    out_flat = pl.pallas_call(
        kernel,
        out_shape=jax.ShapeDtypeStruct((N, C3, Ho * Wo), x_nchw.dtype),
        grid_spec=pltpu.PrefetchScalarGridSpec(
            num_scalar_prefetch=0,
            grid=(N,),
            in_specs=[
                pl.BlockSpec((1, Cin, H * W), lambda n: (n, 0, 0)),
                _replicated_spec(w1.shape), _replicated_spec(b1.shape),
                _replicated_spec(s1.shape),
                _replicated_spec(w2.shape), _replicated_spec(b2.shape),
                _replicated_spec(s2.shape),
                _replicated_spec(w3.shape), _replicated_spec(b3.shape),
            ],
            out_specs=pl.BlockSpec((1, C3, Ho * Wo), lambda n: (n, 0, 0)),
        ),
        compiler_params=pltpu.CompilerParams(dimension_semantics=("parallel",)),
    )(x_flat, w1, b1, s1, w2, b2, s2, w3, b3)

    return out_flat.reshape(N, C3, Ho, Wo)


# ----------------------------------------------------------------------------
# Parameters + pure-JAX reference (numerical sanity check).
# ----------------------------------------------------------------------------
def _conv_init(key, cin, cout):
    # Deterministic PyTorch-Conv2d-style uniform init, bound = 1/sqrt(fan_in).
    kw, kb = jax.random.split(key)
    fan_in = cin * 3 * 3
    bound = 1.0 / (fan_in ** 0.5)
    w = jax.random.uniform(kw, (cout, cin, 3, 3), jnp.float32, -bound, bound)
    b = jax.random.uniform(kb, (cout,), jnp.float32, -bound, bound)
    return w, b


def init_params(key, nchannels):
    k1, k2, k3 = jax.random.split(key, 3)
    w1, b1 = _conv_init(k1, nchannels, 32)
    w2, b2 = _conv_init(k2, 32, 16)
    w3, b3 = _conv_init(k3, 16, 8)
    return {"w1": w1, "b1": b1, "w2": w2, "b2": b2, "w3": w3, "b3": b3}


def _reference_forward(x_nchw, params):
    def conv(x, w, b):
        y = lax.conv_general_dilated(
            x, w, window_strides=(1, 1), padding="SAME",
            dimension_numbers=("NCHW", "OIHW", "NCHW"),
            precision=lax.Precision.HIGHEST)
        return jax.nn.relu(y + b[None, :, None, None])

    def pool(x):
        return lax.reduce_window(x, -jnp.inf, lax.max,
                                 (1, 1, 2, 2), (1, 1, 2, 2), "VALID")

    x = conv(x_nchw, params["w1"], params["b1"]); x = pool(x)
    x = conv(x, params["w2"], params["b2"]); x = pool(x)
    x = conv(x, params["w3"], params["b3"])
    return x


# ----------------------------------------------------------------------------
# Main
# ----------------------------------------------------------------------------
if __name__ == "__main__":
    # Small synthetic config: RPIX = CPIX = 16, nchannels = 1 (grayscale), batch = 2.
    RPIX, CPIX, NCHANNELS, BATCH = 16, 16, 1, 2

    key = jax.random.PRNGKey(0)
    k_params, k_x = jax.random.split(key)

    params = init_params(k_params, NCHANNELS)
    x = jax.random.normal(k_x, (BATCH, NCHANNELS, RPIX, CPIX), jnp.float32)

    out = optical_damage_compress(x, params)
    out = jax.block_until_ready(out)

    assert out.shape == (BATCH, 8, RPIX // 4, CPIX // 4), out.shape

    # Loose tolerance: the Pallas convs/pool-select use the default MXU precision
    # path with f32 accumulation; the reference runs at Precision.HIGHEST.
    ref = _reference_forward(x, params)
    ok = bool(jnp.allclose(out, ref, atol=5e-2, rtol=5e-2))
    max_err = float(jnp.max(jnp.abs(out - ref)))
    assert ok, f"mismatch vs reference: max abs error = {max_err}"

    print("KERNEL_OK")
</pallas_src>

<mosaic_0001>
module attributes {stable_mosaic.version = 11 : i64} {
  func.func @_encoder_kernel(%arg0: i32, %arg1: memref<1x1x256xf32, #tpu.memory_space<vmem>>, %arg2: memref<32x9xf32, #tpu.memory_space<vmem>>, %arg3: memref<32x1xf32, #tpu.memory_space<vmem>>, %arg4: memref<256x64xf32, #tpu.memory_space<vmem>>, %arg5: memref<16x288xf32, #tpu.memory_space<vmem>>, %arg6: memref<16x1xf32, #tpu.memory_space<vmem>>, %arg7: memref<64x16xf32, #tpu.memory_space<vmem>>, %arg8: memref<8x144xf32, #tpu.memory_space<vmem>>, %arg9: memref<8x1xf32, #tpu.memory_space<vmem>>, %arg10: memref<1x8x16xf32, #tpu.memory_space<vmem>>) attributes {dimension_semantics = [#tpu.dimension_semantics<parallel>], iteration_bounds = array<i64: 2>, scalar_prefetch = 0 : i64, scratch_operands = 0 : i64, tpu.core_type = #tpu.core_type<tc>, window_params = [{transform_indices = @transform_0, window_bounds = array<i64: 1, 1, 256>}, {pipeline_mode = #tpu.pipeline_mode<synchronous>, transform_indices = @transform_1, window_bounds = array<i64: 32, 9>}, {pipeline_mode = #tpu.pipeline_mode<synchronous>, transform_indices = @transform_2, window_bounds = array<i64: 32, 1>}, {pipeline_mode = #tpu.pipeline_mode<synchronous>, transform_indices = @transform_3, window_bounds = array<i64: 256, 64>}, {pipeline_mode = #tpu.pipeline_mode<synchronous>, transform_indices = @transform_4, window_bounds = array<i64: 16, 288>}, {pipeline_mode = #tpu.pipeline_mode<synchronous>, transform_indices = @transform_5, window_bounds = array<i64: 16, 1>}, {pipeline_mode = #tpu.pipeline_mode<synchronous>, transform_indices = @transform_6, window_bounds = array<i64: 64, 16>}, {pipeline_mode = #tpu.pipeline_mode<synchronous>, transform_indices = @transform_7, window_bounds = array<i64: 8, 144>}, {pipeline_mode = #tpu.pipeline_mode<synchronous>, transform_indices = @transform_8, window_bounds = array<i64: 8, 1>}, {transform_indices = @transform_9, window_bounds = array<i64: 1, 8, 16>}]} {
    %c0 = arith.constant 0 : index
    %c0_0 = arith.constant 0 : index
    %c0_1 = arith.constant 0 : index
    %0 = vector.load %arg1[%c0, %c0_0, %c0_1] : memref<1x1x256xf32, #tpu.memory_space<vmem>>, vector<1x1x256xf32>
    %1 = vector.shape_cast %0 : vector<1x1x256xf32> to vector<1x256xf32>
    %c0_2 = arith.constant 0 : index
    %c0_3 = arith.constant 0 : index
    %2 = vector.load %arg2[%c0_2, %c0_3] : memref<32x9xf32, #tpu.memory_space<vmem>>, vector<32x9xf32>
    %c0_4 = arith.constant 0 : index
    %c0_5 = arith.constant 0 : index
    %3 = vector.load %arg3[%c0_4, %c0_5] : memref<32x1xf32, #tpu.memory_space<vmem>>, vector<32x1xf32>
    %cst = arith.constant 0.000000e+00 : f32
    %4 = vector.broadcast %cst : f32 to vector<1x17xf32>
    %5 = tpu.concatenate %4, %1, %4 in 1 : vector<1x17xf32>, vector<1x256xf32>, vector<1x17xf32> -> vector<1x290xf32>
    %6 = tpu.iota {dimensions = array<i32: 1>} : vector<1x256xi32>
    %c16_i32 = arith.constant 16 : i32
    %c0_i32 = arith.constant 0 : i32
    %7 = arith.cmpi eq, %c16_i32, %c0_i32 : i32
    %c1_i32 = arith.constant 1 : i32
    %8 = arith.select %7, %c1_i32, %c16_i32 : i32
    %9 = vector.broadcast %8 : i32 to vector<1x256xi32>
    %10 = arith.remsi %6, %9 : vector<1x256xi32>
    %c0_i32_6 = arith.constant 0 : i32
    %11 = vector.broadcast %c0_i32_6 : i32 to vector<1x256xi32>
    %12 = arith.cmpi ne, %10, %11 : vector<1x256xi32>
    %c0_i32_7 = arith.constant 0 : i32
    %13 = vector.broadcast %c0_i32_7 : i32 to vector<1x256xi32>
    %14 = arith.cmpi slt, %10, %13 : vector<1x256xi32>
    %c0_i32_8 = arith.constant 0 : i32
    %15 = arith.cmpi slt, %8, %c0_i32_8 : i32
    %16 = vector.broadcast %15 : i1 to vector<1x256xi1>
    %17 = vector.broadcast %16 : vector<1x256xi1> to vector<1x256xi1>
    %18 = arith.xori %14, %17 : vector<1x256xi1>
    %19 = arith.andi %18, %12 : vector<1x256xi1>
    %20 = vector.broadcast %8 : i32 to vector<1x256xi32>
    %21 = arith.addi %10, %20 : vector<1x256xi32>
    %22 = arith.select %19, %21, %10 : vector<1x256xi1>, vector<1x256xi32>
    %23 = vector.extract_strided_slice %5 {offsets = [0, 0], sizes = [1, 256], strides = [1, 1]} : vector<1x290xf32> to vector<1x256xf32>
    %c1_i32_9 = arith.constant 1 : i32
    %24 = vector.broadcast %c1_i32_9 : i32 to vector<1x256xi32>
    %25 = arith.cmpi sge, %22, %24 : vector<1x256xi32>
    %cst_10 = arith.constant 0.000000e+00 : f32
    %26 = vector.broadcast %cst_10 : f32 to vector<1x256xf32>
    %27 = arith.select %25, %23, %26 : vector<1x256xi1>, vector<1x256xf32>
    %28 = vector.extract_strided_slice %5 {offsets = [0, 1], sizes = [1, 256], strides = [1, 1]} : vector<1x290xf32> to vector<1x256xf32>
    %29 = vector.extract_strided_slice %5 {offsets = [0, 2], sizes = [1, 256], strides = [1, 1]} : vector<1x290xf32> to vector<1x256xf32>
    %c14_i32 = arith.constant 14 : i32
    %30 = vector.broadcast %c14_i32 : i32 to vector<1x256xi32>
    %31 = arith.cmpi sle, %22, %30 : vector<1x256xi32>
    %cst_11 = arith.constant 0.000000e+00 : f32
    %32 = vector.broadcast %cst_11 : f32 to vector<1x256xf32>
    %33 = arith.select %31, %29, %32 : vector<1x256xi1>, vector<1x256xf32>
    %34 = vector.extract_strided_slice %5 {offsets = [0, 16], sizes = [1, 256], strides = [1, 1]} : vector<1x290xf32> to vector<1x256xf32>
    %c1_i32_12 = arith.constant 1 : i32
    %35 = vector.broadcast %c1_i32_12 : i32 to vector<1x256xi32>
    %36 = arith.cmpi sge, %22, %35 : vector<1x256xi32>
    %cst_13 = arith.constant 0.000000e+00 : f32
    %37 = vector.broadcast %cst_13 : f32 to vector<1x256xf32>
    %38 = arith.select %36, %34, %37 : vector<1x256xi1>, vector<1x256xf32>
    %39 = vector.extract_strided_slice %5 {offsets = [0, 17], sizes = [1, 256], strides = [1, 1]} : vector<1x290xf32> to vector<1x256xf32>
    %40 = vector.extract_strided_slice %5 {offsets = [0, 18], sizes = [1, 256], strides = [1, 1]} : vector<1x290xf32> to vector<1x256xf32>
    %c14_i32_14 = arith.constant 14 : i32
    %41 = vector.broadcast %c14_i32_14 : i32 to vector<1x256xi32>
    %42 = arith.cmpi sle, %22, %41 : vector<1x256xi32>
    %cst_15 = arith.constant 0.000000e+00 : f32
    %43 = vector.broadcast %cst_15 : f32 to vector<1x256xf32>
    %44 = arith.select %42, %40, %43 : vector<1x256xi1>, vector<1x256xf32>
    %45 = vector.extract_strided_slice %5 {offsets = [0, 32], sizes = [1, 256], strides = [1, 1]} : vector<1x290xf32> to vector<1x256xf32>
    %c1_i32_16 = arith.constant 1 : i32
    %46 = vector.broadcast %c1_i32_16 : i32 to vector<1x256xi32>
    %47 = arith.cmpi sge, %22, %46 : vector<1x256xi32>
    %cst_17 = arith.constant 0.000000e+00 : f32
    %48 = vector.broadcast %cst_17 : f32 to vector<1x256xf32>
    %49 = arith.select %47, %45, %48 : vector<1x256xi1>, vector<1x256xf32>
    %50 = vector.extract_strided_slice %5 {offsets = [0, 33], sizes = [1, 256], strides = [1, 1]} : vector<1x290xf32> to vector<1x256xf32>
    %51 = vector.extract_strided_slice %5 {offsets = [0, 34], sizes = [1, 256], strides = [1, 1]} : vector<1x290xf32> to vector<1x256xf32>
    %c14_i32_18 = arith.constant 14 : i32
    %52 = vector.broadcast %c14_i32_18 : i32 to vector<1x256xi32>
    %53 = arith.cmpi sle, %22, %52 : vector<1x256xi32>
    %cst_19 = arith.constant 0.000000e+00 : f32
    %54 = vector.broadcast %cst_19 : f32 to vector<1x256xf32>
    %55 = arith.select %53, %51, %54 : vector<1x256xi1>, vector<1x256xf32>
    %56 = tpu.concatenate %27, %28, %33, %38, %39, %44, %49, %50, %55 in 0 : vector<1x256xf32>, vector<1x256xf32>, vector<1x256xf32>, vector<1x256xf32>, vector<1x256xf32>, vector<1x256xf32>, vector<1x256xf32>, vector<1x256xf32>, vector<1x256xf32> -> vector<9x256xf32>
    %cst_20 = arith.constant dense<0.000000e+00> : vector<32x256xf32>
    %57 = tpu.matmul %2, %56, %cst_20 {dimension_numbers = #tpu.dot_dimension_numbers<[1], [0], [0], [1], [0, 0, 1, 1], [], []>} : vector<32x9xf32>, vector<9x256xf32>, vector<32x256xf32> -> vector<32x256xf32>
    %58 = vector.broadcast %3 : vector<32x1xf32> to vector<32x256xf32>
    %59 = arith.addf %57, %58 : vector<32x256xf32>
    %cst_21 = arith.constant 0.000000e+00 : f32
    %60 = vector.broadcast %cst_21 : f32 to vector<32x256xf32>
    %61 = arith.maximumf %59, %60 : vector<32x256xf32>
    %c0_22 = arith.constant 0 : index
    %c0_23 = arith.constant 0 : index
    %62 = vector.load %arg4[%c0_22, %c0_23] : memref<256x64xf32, #tpu.memory_space<vmem>>, vector<256x64xf32>
    %cst_24 = arith.constant 0.000000e+00 : f32
    %63 = vector.broadcast %cst_24 : f32 to vector<32x17xf32>
    %64 = tpu.concatenate %61, %63 in 1 : vector<32x256xf32>, vector<32x17xf32> -> vector<32x273xf32>
    %65 = vector.extract_strided_slice %64 {offsets = [0, 1], sizes = [32, 256], strides = [1, 1]} : vector<32x273xf32> to vector<32x256xf32>
    %66 = vector.extract_strided_slice %64 {offsets = [0, 16], sizes = [32, 256], strides = [1, 1]} : vector<32x273xf32> to vector<32x256xf32>
    %67 = vector.extract_strided_slice %64 {offsets = [0, 17], sizes = [32, 256], strides = [1, 1]} : vector<32x273xf32> to vector<32x256xf32>
    %68 = arith.maximumf %61, %65 : vector<32x256xf32>
    %69 = arith.maximumf %66, %67 : vector<32x256xf32>
    %70 = arith.maximumf %68, %69 : vector<32x256xf32>
    %cst_25 = arith.constant dense<0.000000e+00> : vector<32x64xf32>
    %71 = tpu.matmul %70, %62, %cst_25 {dimension_numbers = #tpu.dot_dimension_numbers<[1], [0], [0], [1], [0, 0, 1, 1], [], []>} : vector<32x256xf32>, vector<256x64xf32>, vector<32x64xf32> -> vector<32x64xf32>
    %c0_26 = arith.constant 0 : index
    %c0_27 = arith.constant 0 : index
    %72 = vector.load %arg5[%c0_26, %c0_27] : memref<16x288xf32, #tpu.memory_space<vmem>>, vector<16x288xf32>
    %c0_28 = arith.constant 0 : index
    %c0_29 = arith.constant 0 : index
    %73 = vector.load %arg6[%c0_28, %c0_29] : memref<16x1xf32, #tpu.memory_space<vmem>>, vector<16x1xf32>
    %cst_30 = arith.constant 0.000000e+00 : f32
    %74 = vector.broadcast %cst_30 : f32 to vector<32x9xf32>
    %75 = tpu.concatenate %74, %71, %74 in 1 : vector<32x9xf32>, vector<32x64xf32>, vector<32x9xf32> -> vector<32x82xf32>
    %76 = tpu.iota {dimensions = array<i32: 1>} : vector<1x64xi32>
    %c8_i32 = arith.constant 8 : i32
    %c0_i32_31 = arith.constant 0 : i32
    %77 = arith.cmpi eq, %c8_i32, %c0_i32_31 : i32
    %c1_i32_32 = arith.constant 1 : i32
    %78 = arith.select %77, %c1_i32_32, %c8_i32 : i32
    %79 = vector.broadcast %78 : i32 to vector<1x64xi32>
    %80 = arith.remsi %76, %79 : vector<1x64xi32>
    %c0_i32_33 = arith.constant 0 : i32
    %81 = vector.broadcast %c0_i32_33 : i32 to vector<1x64xi32>
    %82 = arith.cmpi ne, %80, %81 : vector<1x64xi32>
    %c0_i32_34 = arith.constant 0 : i32
    %83 = vector.broadcast %c0_i32_34 : i32 to vector<1x64xi32>
    %84 = arith.cmpi slt, %80, %83 : vector<1x64xi32>
    %c0_i32_35 = arith.constant 0 : i32
    %85 = arith.cmpi slt, %78, %c0_i32_35 : i32
    %86 = vector.broadcast %85 : i1 to vector<1x64xi1>
    %87 = vector.broadcast %86 : vector<1x64xi1> to vector<1x64xi1>
    %88 = arith.xori %84, %87 : vector<1x64xi1>
    %89 = arith.andi %88, %82 : vector<1x64xi1>
    %90 = vector.broadcast %78 : i32 to vector<1x64xi32>
    %91 = arith.addi %80, %90 : vector<1x64xi32>
    %92 = arith.select %89, %91, %80 : vector<1x64xi1>, vector<1x64xi32>
    %93 = vector.extract_strided_slice %75 {offsets = [0, 0], sizes = [32, 64], strides = [1, 1]} : vector<32x82xf32> to vector<32x64xf32>
    %c1_i32_36 = arith.constant 1 : i32
    %94 = vector.broadcast %c1_i32_36 : i32 to vector<1x64xi32>
    %95 = arith.cmpi sge, %92, %94 : vector<1x64xi32>
    %cst_37 = arith.constant 0.000000e+00 : f32
    %96 = vector.shape_cast %95 : vector<1x64xi1> to vector<1x64xi1>
    %97 = vector.broadcast %96 : vector<1x64xi1> to vector<32x64xi1>
    %98 = vector.broadcast %cst_37 : f32 to vector<32x64xf32>
    %99 = arith.select %97, %93, %98 : vector<32x64xi1>, vector<32x64xf32>
    %100 = vector.extract_strided_slice %75 {offsets = [0, 1], sizes = [32, 64], strides = [1, 1]} : vector<32x82xf32> to vector<32x64xf32>
    %101 = vector.extract_strided_slice %75 {offsets = [0, 2], sizes = [32, 64], strides = [1, 1]} : vector<32x82xf32> to vector<32x64xf32>
    %c6_i32 = arith.constant 6 : i32
    %102 = vector.broadcast %c6_i32 : i32 to vector<1x64xi32>
    %103 = arith.cmpi sle, %92, %102 : vector<1x64xi32>
    %cst_38 = arith.constant 0.000000e+00 : f32
    %104 = vector.shape_cast %103 : vector<1x64xi1> to vector<1x64xi1>
    %105 = vector.broadcast %104 : vector<1x64xi1> to vector<32x64xi1>
    %106 = vector.broadcast %cst_38 : f32 to vector<32x64xf32>
    %107 = arith.select %105, %101, %106 : vector<32x64xi1>, vector<32x64xf32>
    %108 = vector.extract_strided_slice %75 {offsets = [0, 8], sizes = [32, 64], strides = [1, 1]} : vector<32x82xf32> to vector<32x64xf32>
    %c1_i32_39 = arith.constant 1 : i32
    %109 = vector.broadcast %c1_i32_39 : i32 to vector<1x64xi32>
    %110 = arith.cmpi sge, %92, %109 : vector<1x64xi32>
    %cst_40 = arith.constant 0.000000e+00 : f32
    %111 = vector.shape_cast %110 : vector<1x64xi1> to vector<1x64xi1>
    %112 = vector.broadcast %111 : vector<1x64xi1> to vector<32x64xi1>
    %113 = vector.broadcast %cst_40 : f32 to vector<32x64xf32>
    %114 = arith.select %112, %108, %113 : vector<32x64xi1>, vector<32x64xf32>
    %115 = vector.extract_strided_slice %75 {offsets = [0, 9], sizes = [32, 64], strides = [1, 1]} : vector<32x82xf32> to vector<32x64xf32>
    %116 = vector.extract_strided_slice %75 {offsets = [0, 10], sizes = [32, 64], strides = [1, 1]} : vector<32x82xf32> to vector<32x64xf32>
    %c6_i32_41 = arith.constant 6 : i32
    %117 = vector.broadcast %c6_i32_41 : i32 to vector<1x64xi32>
    %118 = arith.cmpi sle, %92, %117 : vector<1x64xi32>
    %cst_42 = arith.constant 0.000000e+00 : f32
    %119 = vector.shape_cast %118 : vector<1x64xi1> to vector<1x64xi1>
    %120 = vector.broadcast %119 : vector<1x64xi1> to vector<32x64xi1>
    %121 = vector.broadcast %cst_42 : f32 to vector<32x64xf32>
    %122 = arith.select %120, %116, %121 : vector<32x64xi1>, vector<32x64xf32>
    %123 = vector.extract_strided_slice %75 {offsets = [0, 16], sizes = [32, 64], strides = [1, 1]} : vector<32x82xf32> to vector<32x64xf32>
    %c1_i32_43 = arith.constant 1 : i32
    %124 = vector.broadcast %c1_i32_43 : i32 to vector<1x64xi32>
    %125 = arith.cmpi sge, %92, %124 : vector<1x64xi32>
    %cst_44 = arith.constant 0.000000e+00 : f32
    %126 = vector.shape_cast %125 : vector<1x64xi1> to vector<1x64xi1>
    %127 = vector.broadcast %126 : vector<1x64xi1> to vector<32x64xi1>
    %128 = vector.broadcast %cst_44 : f32 to vector<32x64xf32>
    %129 = arith.select %127, %123, %128 : vector<32x64xi1>, vector<32x64xf32>
    %130 = vector.extract_strided_slice %75 {offsets = [0, 17], sizes = [32, 64], strides = [1, 1]} : vector<32x82xf32> to vector<32x64xf32>
    %131 = vector.extract_strided_slice %75 {offsets = [0, 18], sizes = [32, 64], strides = [1, 1]} : vector<32x82xf32> to vector<32x64xf32>
    %c6_i32_45 = arith.constant 6 : i32
    %132 = vector.broadcast %c6_i32_45 : i32 to vector<1x64xi32>
    %133 = arith.cmpi sle, %92, %132 : vector<1x64xi32>
    %cst_46 = arith.constant 0.000000e+00 : f32
    %134 = vector.shape_cast %133 : vector<1x64xi1> to vector<1x64xi1>
    %135 = vector.broadcast %134 : vector<1x64xi1> to vector<32x64xi1>
    %136 = vector.broadcast %cst_46 : f32 to vector<32x64xf32>
    %137 = arith.select %135, %131, %136 : vector<32x64xi1>, vector<32x64xf32>
    %138 = tpu.concatenate %99, %100, %107, %114, %115, %122, %129, %130, %137 in 0 : vector<32x64xf32>, vector<32x64xf32>, vector<32x64xf32>, vector<32x64xf32>, vector<32x64xf32>, vector<32x64xf32>, vector<32x64xf32>, vector<32x64xf32>, vector<32x64xf32> -> vector<288x64xf32>
    %cst_47 = arith.constant dense<0.000000e+00> : vector<16x64xf32>
    %139 = tpu.matmul %72, %138, %cst_47 {dimension_numbers = #tpu.dot_dimension_numbers<[1], [0], [0], [1], [0, 0, 1, 1], [], []>} : vector<16x288xf32>, vector<288x64xf32>, vector<16x64xf32> -> vector<16x64xf32>
    %140 = vector.broadcast %73 : vector<16x1xf32> to vector<16x64xf32>
    %141 = arith.addf %139, %140 : vector<16x64xf32>
    %cst_48 = arith.constant 0.000000e+00 : f32
    %142 = vector.broadcast %cst_48 : f32 to vector<16x64xf32>
    %143 = arith.maximumf %141, %142 : vector<16x64xf32>
    %c0_49 = arith.constant 0 : index
    %c0_50 = arith.constant 0 : index
    %144 = vector.load %arg7[%c0_49, %c0_50] : memref<64x16xf32, #tpu.memory_space<vmem>>, vector<64x16xf32>
    %cst_51 = arith.constant 0.000000e+00 : f32
    %145 = vector.broadcast %cst_51 : f32 to vector<16x9xf32>
    %146 = tpu.concatenate %143, %145 in 1 : vector<16x64xf32>, vector<16x9xf32> -> vector<16x73xf32>
    %147 = vector.extract_strided_slice %146 {offsets = [0, 1], sizes = [16, 64], strides = [1, 1]} : vector<16x73xf32> to vector<16x64xf32>
    %148 = vector.extract_strided_slice %146 {offsets = [0, 8], sizes = [16, 64], strides = [1, 1]} : vector<16x73xf32> to vector<16x64xf32>
    %149 = vector.extract_strided_slice %146 {offsets = [0, 9], sizes = [16, 64], strides = [1, 1]} : vector<16x73xf32> to vector<16x64xf32>
    %150 = arith.maximumf %143, %147 : vector<16x64xf32>
    %151 = arith.maximumf %148, %149 : vector<16x64xf32>
    %152 = arith.maximumf %150, %151 : vector<16x64xf32>
    %cst_52 = arith.constant dense<0.000000e+00> : vector<16x16xf32>
    %153 = tpu.matmul %152, %144, %cst_52 {dimension_numbers = #tpu.dot_dimension_numbers<[1], [0], [0], [1], [0, 0, 1, 1], [], []>} : vector<16x64xf32>, vector<64x16xf32>, vector<16x16xf32> -> vector<16x16xf32>
    %c0_53 = arith.constant 0 : index
    %c0_54 = arith.constant 0 : index
    %154 = vector.load %arg8[%c0_53, %c0_54] : memref<8x144xf32, #tpu.memory_space<vmem>>, vector<8x144xf32>
    %c0_55 = arith.constant 0 : index
    %c0_56 = arith.constant 0 : index
    %155 = vector.load %arg9[%c0_55, %c0_56] : memref<8x1xf32, #tpu.memory_space<vmem>>, vector<8x1xf32>
    %cst_57 = arith.constant 0.000000e+00 : f32
    %156 = vector.broadcast %cst_57 : f32 to vector<16x5xf32>
    %157 = tpu.concatenate %156, %153, %156 in 1 : vector<16x5xf32>, vector<16x16xf32>, vector<16x5xf32> -> vector<16x26xf32>
    %158 = tpu.iota {dimensions = array<i32: 1>} : vector<1x16xi32>
    %c4_i32 = arith.constant 4 : i32
    %c0_i32_58 = arith.constant 0 : i32
    %159 = arith.cmpi eq, %c4_i32, %c0_i32_58 : i32
    %c1_i32_59 = arith.constant 1 : i32
    %160 = arith.select %159, %c1_i32_59, %c4_i32 : i32
    %161 = vector.broadcast %160 : i32 to vector<1x16xi32>
    %162 = arith.remsi %158, %161 : vector<1x16xi32>
    %c0_i32_60 = arith.constant 0 : i32
    %163 = vector.broadcast %c0_i32_60 : i32 to vector<1x16xi32>
    %164 = arith.cmpi ne, %162, %163 : vector<1x16xi32>
    %c0_i32_61 = arith.constant 0 : i32
    %165 = vector.broadcast %c0_i32_61 : i32 to vector<1x16xi32>
    %166 = arith.cmpi slt, %162, %165 : vector<1x16xi32>
    %c0_i32_62 = arith.constant 0 : i32
    %167 = arith.cmpi slt, %160, %c0_i32_62 : i32
    %168 = vector.broadcast %167 : i1 to vector<1x16xi1>
    %169 = vector.broadcast %168 : vector<1x16xi1> to vector<1x16xi1>
    %170 = arith.xori %166, %169 : vector<1x16xi1>
    %171 = arith.andi %170, %164 : vector<1x16xi1>
    %172 = vector.broadcast %160 : i32 to vector<1x16xi32>
    %173 = arith.addi %162, %172 : vector<1x16xi32>
    %174 = arith.select %171, %173, %162 : vector<1x16xi1>, vector<1x16xi32>
    %175 = vector.extract_strided_slice %157 {offsets = [0, 0], sizes = [16, 16], strides = [1, 1]} : vector<16x26xf32> to vector<16x16xf32>
    %c1_i32_63 = arith.constant 1 : i32
    %176 = vector.broadcast %c1_i32_63 : i32 to vector<1x16xi32>
    %177 = arith.cmpi sge, %174, %176 : vector<1x16xi32>
    %cst_64 = arith.constant 0.000000e+00 : f32
    %178 = vector.shape_cast %177 : vector<1x16xi1> to vector<1x16xi1>
    %179 = vector.broadcast %178 : vector<1x16xi1> to vector<16x16xi1>
    %180 = vector.broadcast %cst_64 : f32 to vector<16x16xf32>
    %181 = arith.select %179, %175, %180 : vector<16x16xi1>, vector<16x16xf32>
    %182 = vector.extract_strided_slice %157 {offsets = [0, 1], sizes = [16, 16], strides = [1, 1]} : vector<16x26xf32> to vector<16x16xf32>
    %183 = vector.extract_strided_slice %157 {offsets = [0, 2], sizes = [16, 16], strides = [1, 1]} : vector<16x26xf32> to vector<16x16xf32>
    %c2_i32 = arith.constant 2 : i32
    %184 = vector.broadcast %c2_i32 : i32 to vector<1x16xi32>
    %185 = arith.cmpi sle, %174, %184 : vector<1x16xi32>
    %cst_65 = arith.constant 0.000000e+00 : f32
    %186 = vector.shape_cast %185 : vector<1x16xi1> to vector<1x16xi1>
    %187 = vector.broadcast %186 : vector<1x16xi1> to vector<16x16xi1>
    %188 = vector.broadcast %cst_65 : f32 to vector<16x16xf32>
    %189 = arith.select %187, %183, %188 : vector<16x16xi1>, vector<16x16xf32>
    %190 = vector.extract_strided_slice %157 {offsets = [0, 4], sizes = [16, 16], strides = [1, 1]} : vector<16x26xf32> to vector<16x16xf32>
    %c1_i32_66 = arith.constant 1 : i32
    %191 = vector.broadcast %c1_i32_66 : i32 to vector<1x16xi32>
    %192 = arith.cmpi sge, %174, %191 : vector<1x16xi32>
    %cst_67 = arith.constant 0.000000e+00 : f32
    %193 = vector.shape_cast %192 : vector<1x16xi1> to vector<1x16xi1>
    %194 = vector.broadcast %193 : vector<1x16xi1> to vector<16x16xi1>
    %195 = vector.broadcast %cst_67 : f32 to vector<16x16xf32>
    %196 = arith.select %194, %190, %195 : vector<16x16xi1>, vector<16x16xf32>
    %197 = vector.extract_strided_slice %157 {offsets = [0, 5], sizes = [16, 16], strides = [1, 1]} : vector<16x26xf32> to vector<16x16xf32>
    %198 = vector.extract_strided_slice %157 {offsets = [0, 6], sizes = [16, 16], strides = [1, 1]} : vector<16x26xf32> to vector<16x16xf32>
    %c2_i32_68 = arith.constant 2 : i32
    %199 = vector.broadcast %c2_i32_68 : i32 to vector<1x16xi32>
    %200 = arith.cmpi sle, %174, %199 : vector<1x16xi32>
    %cst_69 = arith.constant 0.000000e+00 : f32
    %201 = vector.shape_cast %200 : vector<1x16xi1> to vector<1x16xi1>
    %202 = vector.broadcast %201 : vector<1x16xi1> to vector<16x16xi1>
    %203 = vector.broadcast %cst_69 : f32 to vector<16x16xf32>
    %204 = arith.select %202, %198, %203 : vector<16x16xi1>, vector<16x16xf32>
    %205 = vector.extract_strided_slice %157 {offsets = [0, 8], sizes = [16, 16], strides = [1, 1]} : vector<16x26xf32> to vector<16x16xf32>
    %c1_i32_70 = arith.constant 1 : i32
    %206 = vector.broadcast %c1_i32_70 : i32 to vector<1x16xi32>
    %207 = arith.cmpi sge, %174, %206 : vector<1x16xi32>
    %cst_71 = arith.constant 0.000000e+00 : f32
    %208 = vector.shape_cast %207 : vector<1x16xi1> to vector<1x16xi1>
    %209 = vector.broadcast %208 : vector<1x16xi1> to vector<16x16xi1>
    %210 = vector.broadcast %cst_71 : f32 to vector<16x16xf32>
    %211 = arith.select %209, %205, %210 : vector<16x16xi1>, vector<16x16xf32>
    %212 = vector.extract_strided_slice %157 {offsets = [0, 9], sizes = [16, 16], strides = [1, 1]} : vector<16x26xf32> to vector<16x16xf32>
    %213 = vector.extract_strided_slice %157 {offsets = [0, 10], sizes = [16, 16], strides = [1, 1]} : vector<16x26xf32> to vector<16x16xf32>
    %c2_i32_72 = arith.constant 2 : i32
    %214 = vector.broadcast %c2_i32_72 : i32 to vector<1x16xi32>
    %215 = arith.cmpi sle, %174, %214 : vector<1x16xi32>
    %cst_73 = arith.constant 0.000000e+00 : f32
    %216 = vector.shape_cast %215 : vector<1x16xi1> to vector<1x16xi1>
    %217 = vector.broadcast %216 : vector<1x16xi1> to vector<16x16xi1>
    %218 = vector.broadcast %cst_73 : f32 to vector<16x16xf32>
    %219 = arith.select %217, %213, %218 : vector<16x16xi1>, vector<16x16xf32>
    %220 = tpu.concatenate %181, %182, %189, %196, %197, %204, %211, %212, %219 in 0 : vector<16x16xf32>, vector<16x16xf32>, vector<16x16xf32>, vector<16x16xf32>, vector<16x16xf32>, vector<16x16xf32>, vector<16x16xf32>, vector<16x16xf32>, vector<16x16xf32> -> vector<144x16xf32>
    %cst_74 = arith.constant dense<0.000000e+00> : vector<8x16xf32>
    %221 = tpu.matmul %154, %220, %cst_74 {dimension_numbers = #tpu.dot_dimension_numbers<[1], [0], [0], [1], [0, 0, 1, 1], [], []>} : vector<8x144xf32>, vector<144x16xf32>, vector<8x16xf32> -> vector<8x16xf32>
    %222 = vector.broadcast %155 : vector<8x1xf32> to vector<8x16xf32>
    %223 = arith.addf %221, %222 : vector<8x16xf32>
    %cst_75 = arith.constant 0.000000e+00 : f32
    %224 = vector.broadcast %cst_75 : f32 to vector<8x16xf32>
    %225 = arith.maximumf %223, %224 : vector<8x16xf32>
    %c0_76 = arith.constant 0 : index
    %c0_77 = arith.constant 0 : index
    %c0_78 = arith.constant 0 : index
    %226 = vector.load %arg10[%c0_76, %c0_77, %c0_78] : memref<1x8x16xf32, #tpu.memory_space<vmem>>, vector<1x8x16xf32>
    %227 = vector.shape_cast %226 : vector<1x8x16xf32> to vector<8x16xf32>
    %228 = vector.shape_cast %225 : vector<8x16xf32> to vector<1x8x16xf32>
    tpu.vector_store %arg10[%c0_76, %c0_77, %c0_78], %228 {strides = array<i32>} : memref<1x8x16xf32, #tpu.memory_space<vmem>>, vector<1x8x16xf32>,
    return
  }
  func.func @transform_0(%arg0: i32) -> (i32, i32, i32) {
    %c0_i32 = arith.constant 0 : i32
    %c0_i32_0 = arith.constant 0 : i32
    %c0_i32_1 = arith.constant 0 : i32
    return %arg0, %c0_i32, %c0_i32_0 : i32, i32, i32
  }
  func.func @transform_1(%arg0: i32) -> (i32, i32) {
    %c0_i32 = arith.constant 0 : i32
    %c0_i32_0 = arith.constant 0 : i32
    %c0_i32_1 = arith.constant 0 : i32
    return %c0_i32, %c0_i32_0 : i32, i32
  }
  func.func @transform_2(%arg0: i32) -> (i32, i32) {
    %c0_i32 = arith.constant 0 : i32
    %c0_i32_0 = arith.constant 0 : i32
    %c0_i32_1 = arith.constant 0 : i32
    return %c0_i32, %c0_i32_0 : i32, i32
  }
  func.func @transform_3(%arg0: i32) -> (i32, i32) {
    %c0_i32 = arith.constant 0 : i32
    %c0_i32_0 = arith.constant 0 : i32
    %c0_i32_1 = arith.constant 0 : i32
    return %c0_i32, %c0_i32_0 : i32, i32
  }
  func.func @transform_4(%arg0: i32) -> (i32, i32) {
    %c0_i32 = arith.constant 0 : i32
    %c0_i32_0 = arith.constant 0 : i32
    %c0_i32_1 = arith.constant 0 : i32
    return %c0_i32, %c0_i32_0 : i32, i32
  }
  func.func @transform_5(%arg0: i32) -> (i32, i32) {
    %c0_i32 = arith.constant 0 : i32
    %c0_i32_0 = arith.constant 0 : i32
    %c0_i32_1 = arith.constant 0 : i32
    return %c0_i32, %c0_i32_0 : i32, i32
  }
  func.func @transform_6(%arg0: i32) -> (i32, i32) {
    %c0_i32 = arith.constant 0 : i32
    %c0_i32_0 = arith.constant 0 : i32
    %c0_i32_1 = arith.constant 0 : i32
    return %c0_i32, %c0_i32_0 : i32, i32
  }
  func.func @transform_7(%arg0: i32) -> (i32, i32) {
    %c0_i32 = arith.constant 0 : i32
    %c0_i32_0 = arith.constant 0 : i32
    %c0_i32_1 = arith.constant 0 : i32
    return %c0_i32, %c0_i32_0 : i32, i32
  }
  func.func @transform_8(%arg0: i32) -> (i32, i32) {
    %c0_i32 = arith.constant 0 : i32
    %c0_i32_0 = arith.constant 0 : i32
    %c0_i32_1 = arith.constant 0 : i32
    return %c0_i32, %c0_i32_0 : i32, i32
  }
  func.func @transform_9(%arg0: i32) -> (i32, i32, i32) {
    %c0_i32 = arith.constant 0 : i32
    %c0_i32_0 = arith.constant 0 : i32
    %c0_i32_1 = arith.constant 0 : i32
    return %arg0, %c0_i32, %c0_i32_0 : i32, i32, i32
  }
}

</mosaic_0001>

<bundles_post_ra>
// kernel: optical_damage_compress.1
= control target key start
LH: loop header
LB: loop body
LE: loop exit
PB: predicated region body
PF: predicated region fallthrough
CT: control target
= control target key end

     0   :  { %s2245_s30 = smov 0   ;;  %s2751_s0 = inlined_call_operand.vmem [shape: f32[2,1,256], index: 0, kind: input, shape index: {}]   ;;  %s2752_s1 = inlined_call_operand.vmem [shape: f32[32,9], index: 1, kind: input, shape index: {}]   ;;  %s2753_s2 = inlined_call_operand.vmem [shape: f32[32,1], index: 2, kind: input, shape index: {}]   ;;  %s2754_s3 = inlined_call_operand.vmem [shape: f32[256,64], index: 3, kind: input, shape index: {}]   ;;  %s2755_s4 = inlined_call_operand.vmem [shape: f32[16,288], index: 4, kind: input, shape index: {}]   ;;  %s2756_s5 = inlined_call_operand.vmem [shape: f32[16,1], index: 5, kind: input, shape index: {}]   ;;  %s2757_s6 = inlined_call_operand.vmem [shape: f32[64,16], index: 6, kind: input, shape index: {}]   ;;  %s2758_s7 = inlined_call_operand.vmem [shape: f32[8,144], index: 7, kind: input, shape index: {}]   ;;  %s2759_s8 = inlined_call_operand.vmem [shape: f32[8,1], index: 8, kind: input, shape index: {}]   ;;  %s2760_s9 = inlined_call_operand.vmem [shape: f32[2,8,16], index: 9, kind: output, shape index: {}]  }
   0x1 LB: > { %s1590_s10 = sadd.s32 4294967295, %s2172_s30   ;;  %p1594_p0 = scmp.ge.s32.totalorder %s2172_s30, 1  ;;  %s2172_s30 = sphi %s2245_s30, %s19_s30  }
   0x2   : > { %p286_p1 = scmp.lt.s32.totalorder %s2172_s30, 3 }
   0x4   : > { %p287_p2 = pnand %p1594_p0, %p286_p1 }
   0x5   : > { %p320_p3 = scmp.lt.s32.totalorder (!%p287_p2), %s1590_s10, 1  ;;  %v338_v0 = vlaneseq (!%p287_p2)  ;;  %s2174_s15 = smov (!%p287_p2), 17   ;;  %vm350_vm0 = vcmask (!%p287_p2), 138240   ;;  %v2182_v25 = vmov (!%p287_p2), 0.0   ;;  %v333_v28 = vld [vmem:[%s2753_s2] sm:$0xff] (!%p287_p2)  ;;  %v2184_v29 = vmov (!%p287_p2), 0  }
   0x6   : > { %290 = sbr.rel (%p287_p2) target bundleno = 2413 (0x96d), region = 56  ;;  %s2175_s16 = smov (!%p287_p2), 126   ;;  %647 = vmatprep.mubr.f32.mxu1 (!%p287_p2), %v2182_v25  ;;  %1989 = vset.pattern.permute.xlu1 (!%p287_p2), %v2184_v29  ;;  %v334_v30 = vld [vmem:[%s2753_s2 + $0x8] sm:$0xff] (!%p287_p2)  ;;  %v335_v31 = vld [vmem:[%s2753_s2 + $0x10] sm:$0xff] (!%p287_p2)  ;;  %v336_v32 = vld [vmem:[%s2753_s2 + $0x18] sm:$0xff] (!%p287_p2)  ;;  %vm398_vm1 = vcmask (!%p287_p2), 1031168  }
   0x7   : > { %v339_v1 = vshrl.u32 (!%p287_p2), %v338_v0, 7  ;;  %s2176_s17 = smov (!%p287_p2), 112   ;;  %s2177_s18 = smov (!%p287_p2), 96   ;;  %1990 = vset.pattern.permute.xlu0 (!%p287_p2), %v2184_v29  ;;  %v2300_v33 = vand.u32 (!%p287_p2), 127, %v338_v0  ;;  %vm2761_vm3 = vcmask (!%p287_p2), 916480   ;;  %vm424_vm6 = vcmask (!%p287_p2), 900096  }
   0x8   : > { %s2178_s19 = smov (!%p287_p2), 110   ;;  %s2179_s20 = smov (!%p287_p2), 94   ;;  %vm466_vm7 = vcmask (!%p287_p2), 1039360   ;;  %vm437_vm8 = vcmask (!%p287_p2), 785408   ;;  %vm523_vm11 = vcmask (!%p287_p2), 1040384   ;;  %vm526_vm12 = vcmask (!%p287_p2), 1041408  }
   0x9   : > { %v340_v2 = vsub.s32 (!%p287_p2), 0, %v339_v1  ;;  %v344_v3 = vsub.s32 (!%p287_p2), 1, %v339_v1  ;;  %s2180_s21 = smov (!%p287_p2), 127   ;;  %s2181_s22 = smov (!%p287_p2), 111   ;;  %v359_v37 = vadd.s32 (!%p287_p2), 128, %v2300_v33  ;;  %v364_v39 = vand.u32 (!%p287_p2), 15, %v2300_v33 }
   0xa   : > { %s2183_s23 = smov (!%p287_p2), 95   ;;  %vm450_vm13 = vcmask (!%p287_p2), 769024   ;;  %vm529_vm14 = vcmask (!%p287_p2), 1042432   ;;  %vm518_vm15 = vcmask (!%p287_p2), 777216   ;;  %vm538_vm10 = vcmask (!%p287_p2), 1045504   ;;  %v330_v47 = vld [vmem:[%s2752_s1 + $0x8] sm:$0xff] (!%p287_p2) }
   0xb   : > { %v371_v41 = vand.u32 (!%p287_p2), 15, %v359_v37  ;;  %vm2304_vm2 = vcmp.ge.s32.totalorder (!%p287_p2), %v364_v39, 1  ;;  %vm2310_vm4 = vcmp.le.s32.totalorder (!%p287_p2), %v364_v39, 14  ;;  %v331_v49 = vld [vmem:[%s2752_s1 + $0x10] sm:$0xff] (!%p287_p2)  ;;  %s2189_s25 = smov (!%p287_p2), 120   ;;  %s2191_s27 = smov (!%p287_p2), 5  }
   0xc   : > { %s2192_s28 = smov (!%p287_p2), 123   ;;  %s2194_s29 = smov (!%p287_p2), 122  }
   0xd   : > { %s2789_s10 = smov (!%p320_p3, %s1590_s10), 1  ;;  %vm2314_vm5 = vcmp.ge.s32.totalorder %v371_v41, 1  ;;  %vm2318_vm9 = vcmp.le.s32.totalorder %v371_v41, 14 }
   0xe   : > { %s1595_s11 = sshll.u32 %s2789_s10, 1 }
   0xf   : > { %s323_s14 = scalar_lea.vmem %s2751_s0, %s1595_s11 }
  0x10   : > { %v328_v4 = vld [vmem:[%s323_s14] sm:$0x3] }
  0x11   : > { %v341_v5 = vrot.slane %v328_v4, %v340_v2  ;;  %v345_v6 = vrot.slane %v328_v4, %v344_v3 }
  0x13   : > { %v1944_v7 = vpack.i.bf16 %v345_v6, %v341_v5 }
  0x15   : > { %1945 = vrot.lane.b32.xlu0 %v1944_v7, %s2174_s15  ;;  %s2186_s15 = smov 9  }
  0x87   : > { %v1946_v8 = vpop.permute.xlu0 %1945 }
  0x88   : > { %v1948_v9 = vunpack.i.h.bf16 %v1946_v8  ;;  %v1947_v10 = vunpack.i.l.bf16 %v1946_v8 }
  0x8a   : > { %v356_v11 = vsel %vm350_vm0, %v1948_v9, 0.0  ;;  %v2260_v12 = vsel %vm350_vm0, %v1947_v10, %v1948_v9  ;;  %v2262_v13 = vsel %vm350_vm0, 0.0, %v1947_v10  ;;  %vm532_vm0 = vcmask 1043456  }
  0x8b   : > { %392 = vrot.lane.b32.xlu1 %v2262_v13, %s2175_s16  ;;  %v1949_v14 = vpack.i.bf16 %v356_v11, %v2260_v12  ;;  %v458_v15 = vrot.slane %v2260_v12, 7  ;;  %v459_v16 = vrot.slane %v356_v11, 7  ;;  %v457_v18 = vrot.slane %v2262_v13, 7 }
  0x8c   : > { %v484_v19 = vrot.slane %v2260_v12, 4  ;;  %v485_v20 = vrot.slane %v356_v11, 4  ;;  %v483_v21 = vrot.slane %v2262_v13, 4  ;;  %v510_v22 = vrot.slane %v2260_v12, 1 }
  0x8d   : > { %1950 = vrot.lane.b32.xlu0 %v1949_v14, %s2175_s16  ;;  %v1974_v17 = vpack.i.bf16 %v459_v16, %v458_v15  ;;  %v511_v23 = vrot.slane %v356_v11, 1  ;;  %v509_v27 = vrot.slane %v2262_v13, 1  ;;  %v386_v54 = vsel %vm2304_vm2, %v2262_v13, 0.0 }
  0x8e   : > { %v1979_v24 = vpack.i.bf16 %v485_v20, %v484_v19  ;;  %v387_v58 = vsel %vm2314_vm5, %v2260_v12, 0.0 }
  0x8f   : > { %1955 = vrot.lane.b32.xlu1 %v1949_v14, %s2176_s17  ;;  %v1984_v26 = vpack.i.bf16 %v511_v23, %v510_v22 }
  0x91   : > { %405 = vrot.lane.b32.xlu0 %v2262_v13, %s2176_s17 }
  0x93   : > { %1965 = vrot.lane.b32.xlu1 %v1949_v14, %s2177_s18 }
  0x95   : > { %1960 = vrot.lane.b32.xlu0 %v1949_v14, %s2178_s19 }
  0x97   : > { %1970 = vrot.lane.b32.xlu1 %v1949_v14, %s2179_s20 }
  0x99   : > { %418 = vrot.lane.b32.xlu0 %v2262_v13, %s2178_s19 }
  0x9b   : > { %1975 = vrot.lane.b32.xlu1 %v1974_v17, %s2180_s21 }
  0x9d   : > { %431 = vrot.lane.b32.xlu0 %v2262_v13, %s2177_s18  ;;  %s2187_s18 = smov 119  }
  0x9f   : > { %460 = vrot.lane.b32.xlu1 %v457_v18, %s2180_s21 }
  0xa1   : > { %486 = vrot.lane.b32.xlu0 %v483_v21, %s2181_s22 }
  0xa3   : > { %1980 = vrot.lane.b32.xlu1 %v1979_v24, %s2181_s22 }
  0xa5   : > { %1985 = vrot.lane.b32.xlu0 %v1984_v26, %s2183_s23 }
  0xa7   : > { %444 = vrot.lane.b32.xlu1 %v2262_v13, %s2179_s20  ;;  %s2188_s20 = smov 118  }
  0xa9   : > { %512 = vrot.lane.b32.xlu0 %v509_v27, %s2183_s23 }
  0xab   : > { %546 = vperm.xlu1 %1989, %v333_v28  }
  0xad   : > { %551 = vperm.xlu0 %1990, %v334_v30  }
  0xaf   : > { %556 = vperm.xlu1 %1989, %v335_v31  }
  0xb3   : > { %561 = vperm.xlu1 %1989, %v336_v32  }
  0xfd   : > { %v393_v34 = vpop.permute.xlu1 %392 }
  0xff   : > { %v1951_v35 = vpop.permute.xlu0 %1950 }
 0x100   : > { %v1952_v42 = vunpack.i.l.bf16 %v1951_v35  ;;  %v1953_v44 = vunpack.i.h.bf16 %v1951_v35 }
 0x101   : > { %v1956_v36 = vpop.permute.xlu1 %1955 }
 0x102   : > { %v399_v50 = vsel %vm398_vm1, %v393_v34, %v1952_v42  ;;  %v1958_v51 = vunpack.i.h.bf16 %v1956_v36  ;;  %v1957_v52 = vunpack.i.l.bf16 %v1956_v36  ;;  %v400_v55 = vsel %vm398_vm1, %v1952_v42, %v1953_v44 }
 0x103   : > { %v406_v38 = vpop.permute.xlu0 %405  ;;  %v403_v62 = vsel %vm2310_vm4, %v399_v50, 0.0  ;;  %v404_v4 = vsel %vm2318_vm9, %v400_v55, 0.0  ;;  %vm535_vm1 = vcmask 1044480  }
 0x104   : > { %v413_v1 = vsel %vm2761_vm3, %v1957_v52, %v1958_v51  ;;  %v412_v2 = vsel %vm2761_vm3, %v406_v38, %v1957_v52  ;;  %v473_v9 = vrot.slane %v403_v62, 6  ;;  %vm541_vm3 = vcmask 1046528  }
 0x105   : > { %v1966_v40 = vpop.permute.xlu1 %1965  ;;  %v416_v12 = vsel %vm2304_vm2, %v412_v2, 0.0  ;;  %v417_v14 = vsel %vm2314_vm5, %v413_v1, 0.0  ;;  %v474_v15 = vrot.slane %v404_v4, 6  ;;  %v329_v1 = vld [vmem:[%s2752_s1] sm:$0xff]  ;;  %v332_v2 = vld [vmem:[%s2752_s1 + $0x18] sm:$0xff] }
 0x106   : > { %v1968_v56 = vunpack.i.h.bf16 %v1966_v40  ;;  %v1967_v57 = vunpack.i.l.bf16 %v1966_v40  ;;  %v479_v24 = vrot.slane %v416_v12, 5  ;;  %v480_v29 = vrot.slane %v417_v14, 5 }
 0x107   : > { %v1961_v43 = vpop.permute.xlu0 %1960 }
 0x108   : > { %v1963_v59 = vunpack.i.h.bf16 %v1961_v43  ;;  %v1962_v60 = vunpack.i.l.bf16 %v1961_v43  ;;  %v439_v6 = vsel %vm437_vm8, %v1967_v57, %v1968_v56 }
 0x109   : > { %v2308_v46 = vpop.permute.xlu1 %1970  ;;  %v443_v18 = vsel %vm2314_vm5, %v439_v6, 0.0  ;;  %vm2770_vm5 = vcmask 908288  }
 0x10a   : > { %v426_v8 = vsel %vm424_vm6, %v1962_v60, %v1963_v59  ;;  %v1973_v26 = vunpack.i.h.bf16 %v2308_v46  ;;  %v1972_v27 = vunpack.i.l.bf16 %v2308_v46  ;;  %v506_v34 = vrot.slane %v443_v18, 2 }
 0x10b   : > { %v419_v53 = vpop.permute.xlu0 %418  ;;  %v430_v21 = vsel %vm2318_vm9, %v426_v8, 0.0 }
 0x10c   : > { %v425_v7 = vsel %vm424_vm6, %v419_v53, %v1962_v60  ;;  %v500_v37 = vrot.slane %v430_v21, 3  ;;  %vm2771_vm6 = vmmov %vm2770_vm5  ;;  %v452_v45 = vsel %vm450_vm13, %v1972_v27, %v1973_v26 }
 0x10d   : > { %v1976_v61 = vpop.permute.xlu1 %1975  ;;  %v429_v20 = vsel %vm2310_vm4, %v425_v7, 0.0  ;;  %v456_v59 = vsel %vm2318_vm9, %v452_v45, 0.0  ;;  %v700_v45 = vld [vmem:[%s2754_s3 + $0xa0] sm:$0xff] }
 0x10e   : > { %v1978_v63 = vunpack.i.h.bf16 %v1976_v61  ;;  %v1977_v0 = vunpack.i.l.bf16 %v1976_v61  ;;  %v499_v35 = vrot.slane %v429_v20, 3 }
 0x10f   : > { %v432_v3 = vpop.permute.xlu0 %431 }
 0x110   : > { %v468_v5 = vsel %vm466_vm7, %v1977_v0, %v1978_v63  ;;  %v438_v16 = vsel %vm437_vm8, %v432_v3, %v1967_v57 }
 0x111   : > { %v461_v10 = vpop.permute.xlu1 %460  ;;  %v525_v11 = vsel %vm523_vm11, %v387_v58, %v468_v5  ;;  %v442_v30 = vsel %vm2304_vm2, %v438_v16, 0.0  ;;  %vm2185_vm2 = vmmov 1  }
 0x112   : > { %v467_v13 = vsel %vm466_vm7, %v461_v10, %v1977_v0  ;;  %v528_v23 = vsel %vm526_vm12, %v525_v11, %v474_v15  ;;  %v505_v44 = vrot.slane %v442_v30, 2  ;;  %vm1775_vm8 = vmpackc.low %vm523_vm11, %vm2185_vm2 }
 0x113   : > { %v487_v17 = vpop.permute.xlu0 %486  ;;  %v524_v19 = vsel %vm523_vm11, %v386_v54, %v467_v13  ;;  %v531_v39 = vsel %vm529_vm14, %v528_v23, %v480_v29 }
 0x114   : > { %v527_v22 = vsel %vm526_vm12, %v524_v19, %v473_v9 }
 0x115   : > { %v1981_v28 = vpop.permute.xlu1 %1980  ;;  %v530_v38 = vsel %vm529_vm14, %v527_v22, %v479_v24 }
 0x116   : > { %v1983_v31 = vunpack.i.h.bf16 %v1981_v28  ;;  %v1982_v32 = vunpack.i.l.bf16 %v1981_v28 }
 0x117   : > { %v1986_v36 = vpop.permute.xlu0 %1985 }
 0x118   : > { %v493_v40 = vsel %vm2770_vm5, %v487_v17, %v1982_v32  ;;  %v494_v41 = vsel %vm2771_vm6, %v1982_v32, %v1983_v31  ;;  %v1988_v42 = vunpack.i.h.bf16 %v1986_v36  ;;  %v1987_v43 = vunpack.i.l.bf16 %v1986_v36  ;;  %v696_v32 = vld [vmem:[%s2754_s3 + $0x80] sm:$0xff] }
 0x119   : > { %v445_v46 = vpop.permute.xlu1 %444  ;;  %v534_v48 = vsel %vm532_vm0, %v531_v39, %v494_v41  ;;  %v533_v50 = vsel %vm532_vm0, %v530_v38, %v493_v40  ;;  %v681_v38 = vld [vmem:[%s2754_s3 + $0x8] sm:$0xff]  ;;  %v698_v39 = vld [vmem:[%s2754_s3 + $0x90] sm:$0xff]  ;;  %v699_v40 = vld [vmem:[%s2754_s3 + $0x98] sm:$0xff]  ;;  %vm1086_vm0 = vcmask 261120  }
 0x11a   : > { %v451_v51 = vsel %vm450_vm13, %v445_v46, %v1972_v27  ;;  %v520_v52 = vsel %vm518_vm15, %v1987_v43, %v1988_v42  ;;  %v537_v53 = vsel %vm535_vm1, %v534_v48, %v500_v37  ;;  %v536_v54 = vsel %vm535_vm1, %v533_v50, %v499_v35  ;;  %v680_v35 = vld [vmem:[%s2754_s3] sm:$0xff]  ;;  %v683_v46 = vld [vmem:[%s2754_s3 + $0x18] sm:$0xff]  ;;  %v701_v48 = vld [vmem:[%s2754_s3 + $0xa8] sm:$0xff] }
 0x11b   : > { %v513_v55 = vpop.permute.xlu0 %512  ;;  %v540_v56 = vsel %vm538_vm10, %v537_v53, %v506_v34  ;;  %v539_v57 = vsel %vm538_vm10, %v536_v54, %v505_v44  ;;  %v455_v61 = vsel %vm2310_vm4, %v451_v51, 0.0  ;;  %vm564_vm10 = vcmask 72704   ;;  %v697_v34 = vld [vmem:[%s2754_s3 + $0x88] sm:$0xff]  ;;  %v682_v44 = vld [vmem:[%s2754_s3 + $0x10] sm:$0xff]  ;;  %v684_v53 = vld [vmem:[%s2754_s3 + $0x20] sm:$0xff] }
 0x11c   : > { %v519_v58 = vsel %vm518_vm15, %v513_v55, %v1987_v43  ;;  %v543_v60 = vsel %vm541_vm3, %v540_v56, %v520_v52  ;;  %v1780_v37 = vpack.c.bf16 %v697_v34, %v696_v32  ;;  %v1782_v42 = vpack.c.bf16 %v681_v38, %v680_v35  ;;  %v685_v54 = vld [vmem:[%s2754_s3 + $0x28] sm:$0xff]  ;;  %v702_v55 = vld [vmem:[%s2754_s3 + $0xb0] sm:$0xff]  ;;  %v703_v56 = vld [vmem:[%s2754_s3 + $0xb8] sm:$0xff] }
 0x11d   : > { %v1774_v62 = vpack.c.bf16 %v456_v59, %v543_v60  ;;  %v542_v63 = vsel %vm541_vm3, %v539_v57, %v519_v58  ;;  %v1784_v43 = vpack.c.bf16 %v699_v40, %v698_v39  ;;  %v1786_v51 = vpack.c.bf16 %v683_v46, %v682_v44  ;;  %v686_v59 = vld [vmem:[%s2754_s3 + $0x30] sm:$0xff]  ;;  %v687_v60 = vld [vmem:[%s2754_s3 + $0x38] sm:$0xff] }
 0x11e   : > { %v1777_v0 = vpack.c.bf16 %v455_v61, %v542_v63  ;;  %v1788_v52 = vpack.c.bf16 %v701_v48, %v700_v45  ;;  %v1790_v57 = vpack.c.bf16 %v685_v54, %v684_v53  ;;  %v1792_v58 = vpack.c.bf16 %v703_v56, %v702_v55  ;;  %v704_v61 = vld [vmem:[%s2754_s3 + $0xc0] sm:$0xff]  ;;  %v695_v32 = vld [vmem:[%s2754_s3 + $0x78] sm:$0xff] }
 0x11f   : > { %1776 = vmatprep.subr.msk.bf16.mxu1 %vm1775_vm8, %v1774_v62  ;;  %v705_v62 = vld [vmem:[%s2754_s3 + $0xc8] sm:$0xff]  ;;  %v1794_v63 = vpack.c.bf16 %v687_v60, %v686_v59  ;;  %vm2772_vm3 = vcmask 916480   ;;  %vm929_vm15 = vcmask 596992  }
 0x120   : > { %1779 = vmatpush1.bf16.msk.msra.mxu1 %vm1775_vm8, %v1777_v0  ;;  %v1796_v0 = vpack.c.bf16 %v705_v62, %v704_v61  ;;  %vm2773_vm4 = vmmov %vm2772_vm3  ;;  %vm1253_vm8 = vcmask 523264  }
 0x121   : > { %1781 = vmatprep.subr.bf16.mxu1 %v1780_v37  ;;  %vm2775_vm9 = vmmov %vm2772_vm3 }
 0x122   : > { %vm2776_vm11 = vmmov %vm2772_vm3 }
 0x123   : > { %1599 = vmatmul.mubr.msk.f32.vlgmr.msra.gmra.mrb[0].mxu1 %vm564_vm10, %v329_v1  ;;  %v688_v1 = vld [vmem:[%s2754_s3 + $0x40] sm:$0xff]  ;;  %vm2777_vm12 = vmmov %vm2772_vm3 }
 0x124   : > { %653 = vmatprep.mubr.f32.mxu1 %v2182_v25  ;;  %1783 = vmatpush3.bf16.msra.mxu1 %v1782_v42  ;;  %vm2778_vm13 = vmmov %vm2772_vm3 }
 0x125   : > { %1785 = vmatprep.subr.bf16.mxu1 %v1784_v43  ;;  %vm2779_vm14 = vmmov %vm2772_vm3 }
 0x127   : > { %1600 = vmatmul.mubr.msk.f32.gmra.mrb[2].mxu1 %vm564_vm10, %v330_v47  ;;  %v689_v47 = vld [vmem:[%s2754_s3 + $0x48] sm:$0xff] }
 0x128   : > { %659 = vmatprep.mubr.f32.mxu1 %v2182_v25  ;;  %1787 = vmatpush3.bf16.msra.mxu1 %v1786_v51 }
 0x129   : > { %1789 = vmatprep.subr.bf16.mxu1 %v1788_v52 }
 0x12a   : > { %v547_v3 = vpop.permute.xlu1 %546 }
 0x12b   : > { %1601 = vmatmul.mubr.msk.f32.gmra.mrb[4].mxu1 %vm564_vm10, %v331_v49  ;;  %v706_v49 = vld [vmem:[%s2754_s3 + $0xd0] sm:$0xff] }
 0x12c   : > { %665 = vmatprep.mubr.f32.mxu1 %v2182_v25  ;;  %v552_v8 = vpop.permute.xlu0 %551  ;;  %1791 = vmatpush3.bf16.msra.mxu1 %v1790_v57 }
 0x12d   : > { %1793 = vmatprep.subr.bf16.mxu1 %v1792_v58 }
 0x12e   : > { %v557_v14 = vpop.permute.xlu1 %556 }
 0x12f   : > { %1602 = vmatmul.mubr.msk.f32.gmra.mrb[6].mxu1 %vm564_vm10, %v332_v2  ;;  %v707_v2 = vld [vmem:[%s2754_s3 + $0xd8] sm:$0xff] }
 0x130   : > { %1795 = vmatpush3.bf16.msra.mxu1 %v1794_v63 }
 0x131   : > { %1797 = vmatprep.subr.bf16.mxu1 %v1796_v0 }
 0x132   : > { %v562_v24 = vpop.permute.xlu1 %561 }
 0x1f6   : > { %v649_v4 = vpop.f32.mrb[0].mxu1 }
 0x1f7   : > { %v2400_v5 = vadd.f32 %v649_v4, %v547_v3  ;;  %v651_v6 = vpop.f32.mrb[1].mxu1  ;;  %v1800_v4 = vpack.c.bf16 %v707_v2, %v706_v49 }
 0x1f8   : > { %v2402_v7 = vadd.f32 %v651_v6, %v547_v3  ;;  %v1798_v3 = vpack.c.bf16 %v689_v47, %v688_v1  ;;  %v690_v6 = vld [vmem:[%s2754_s3 + $0x50] sm:$0xff] }
 0x1f9   : > { %v672_v9 = vmax.f32 %v2400_v5, 0.0 }
 0x1fa   : > { %v673_v10 = vmax.f32 %v2402_v7, 0.0  ;;  %v655_v11 = vpop.f32.mrb[2].mxu1  ;;  %1799 = vmatpush3.bf16.msra.mxu1 %v1798_v3 }
 0x1fb   : > { %v2406_v12 = vadd.f32 %v655_v11, %v552_v8  ;;  %v657_v13 = vpop.f32.mrb[3].mxu1  ;;  %721 = vrot.lane.b32.xlu1 %v672_v9, %s2180_s21  ;;  %1801 = vmatprep.subr.bf16.mxu1 %v1800_v4 }
 0x1fc   : > { %v1991_v15 = vpack.i.bf16 %v2182_v25, %v673_v10  ;;  %v2414_v16 = vadd.f32 %v657_v13, %v552_v8  ;;  %v691_v8 = vld [vmem:[%s2754_s3 + $0x58] sm:$0xff]  ;;  %v708_v13 = vld [vmem:[%s2754_s3 + $0xe0] sm:$0xff] }
 0x1fd   : > { %v674_v17 = vmax.f32 %v2406_v12, 0.0  ;;  %v1802_v11 = vpack.c.bf16 %v691_v8, %v690_v6 }
 0x1fe   : > { %v675_v18 = vmax.f32 %v2414_v16, 0.0  ;;  %v661_v19 = vpop.f32.mrb[4].mxu1  ;;  %1992 = vrot.lane.b32.xlu0 %v1991_v15, %s2180_s21  ;;  %v692_v15 = vld [vmem:[%s2754_s3 + $0x60] sm:$0xff] }
 0x1ff   : > { %v2419_v20 = vadd.f32 %v661_v19, %v557_v14  ;;  %v663_v21 = vpop.f32.mrb[5].mxu1  ;;  %1803 = vmatpush3.bf16.msra.mxu1 %v1802_v11 }
 0x200   : > { %v1996_v22 = vpack.i.bf16 %v674_v17, %v675_v18  ;;  %v2425_v23 = vadd.f32 %v663_v21, %v557_v14  ;;  %v709_v14 = vld [vmem:[%s2754_s3 + $0xe8] sm:$0xff] }
 0x201   : > { %v676_v25 = vmax.f32 %v2419_v20, 0.0  ;;  %v1804_v19 = vpack.c.bf16 %v709_v14, %v708_v13  ;;  %v693_v21 = vld [vmem:[%s2754_s3 + $0x68] sm:$0xff] }
 0x202   : > { %v677_v26 = vmax.f32 %v2425_v23, 0.0  ;;  %v667_v27 = vpop.f32.mrb[6].mxu1  ;;  %1997 = vrot.lane.b32.xlu0 %v1996_v22, %s2180_s21  ;;  %v1806_v22 = vpack.c.bf16 %v693_v21, %v692_v15 }
 0x203   : > { %v2430_v28 = vadd.f32 %v667_v27, %v562_v24  ;;  %v669_v29 = vpop.f32.mrb[7].mxu1  ;;  %1805 = vmatprep.subr.bf16.mxu1 %v1804_v19  ;;  %v711_v27 = vld [vmem:[%s2754_s3 + $0xf8] sm:$0xff] }
 0x204   : > { %v2001_v30 = vpack.i.bf16 %v676_v25, %v677_v26  ;;  %v2436_v31 = vadd.f32 %v669_v29, %v562_v24  ;;  %1807 = vmatpush3.bf16.msra.mxu1 %v1806_v22  ;;  %v710_v24 = vld [vmem:[%s2754_s3 + $0xf0] sm:$0xff] }
 0x205   : > { %v678_v36 = vmax.f32 %v2430_v28, 0.0  ;;  %v694_v29 = vld [vmem:[%s2754_s3 + $0x70] sm:$0xff] }
 0x206   : > { %v679_v41 = vmax.f32 %v2436_v31, 0.0  ;;  %2002 = vrot.lane.b32.xlu1 %v2001_v30, %s2180_s21  ;;  %v1808_v30 = vpack.c.bf16 %v711_v27, %v710_v24  ;;  %v1810_v35 = vpack.c.bf16 %v695_v32, %v694_v29 }
 0x208   : > { %v2006_v50 = vpack.i.bf16 %v678_v36, %v679_v41  ;;  %1809 = vmatprep.subr.bf16.mxu1 %v1808_v30 }
 0x209   : > { %1811 = vmatpush3.bf16.msra.mxu1 %v1810_v35 }
 0x20a   : > { %2007 = vrot.lane.b32.xlu0 %v2006_v50, %s2180_s21 }
 0x26d   : > { %v722_v39 = vpop.permute.xlu1 %721 }
 0x270   : > { %v1993_v34 = vpop.permute.xlu0 %1992 }
 0x271   : > { %v1995_v37 = vunpack.i.h.bf16 %v1993_v34  ;;  %v1994_v38 = vunpack.i.l.bf16 %v1993_v34 }
 0x273   : > { %v740_v40 = vsel %vm466_vm7, %v1994_v38, %v1995_v37  ;;  %v739_v42 = vsel %vm466_vm7, %v722_v39, %v1994_v38  ;;  %v764_v43 = vmax.f32 %v1995_v37, 0.0 }
 0x274   : > { %v1998_v44 = vpop.permute.xlu0 %1997  ;;  %v755_v46 = vmax.f32 %v672_v9, %v739_v42  ;;  %v756_v45 = vmax.f32 %v673_v10, %v740_v40 }
 0x275   : > { %v2000_v48 = vunpack.i.h.bf16 %v1998_v44  ;;  %v1999_v50 = vunpack.i.l.bf16 %v1998_v44 }
 0x276   : > { %774 = vrot.lane.b32.xlu0 %v755_v46, %s2176_s17  ;;  %v2011_v51 = vpack.i.bf16 %v764_v43, %v756_v45 }
 0x277   : > { %v741_v52 = vsel %vm466_vm7, %v2000_v48, %v1999_v50  ;;  %v742_v53 = vsel %vm466_vm7, %v1999_v50, %v1995_v37 }
 0x278   : > { %2012 = vrot.lane.b32.xlu1 %v2011_v51, %s2176_s17  ;;  %v2003_v54 = vpop.permute.xlu1 %2002  ;;  %v757_v55 = vmax.f32 %v674_v17, %v741_v52  ;;  %v758_v5 = vmax.f32 %v675_v18, %v742_v53 }
 0x279   : > { %v2005_v7 = vunpack.i.h.bf16 %v2003_v54  ;;  %v2004_v9 = vunpack.i.l.bf16 %v2003_v54 }
 0x27a   : > { %v2016_v10 = vpack.i.bf16 %v757_v55, %v758_v5 }
 0x27b   : > { %v743_v56 = vsel %vm466_vm7, %v2005_v7, %v2004_v9  ;;  %v744_v57 = vsel %vm466_vm7, %v2004_v9, %v1995_v37 }
 0x27c   : > { %v2008_v58 = vpop.permute.xlu0 %2007  ;;  %2017 = vrot.lane.b32.xlu1 %v2016_v10, %s2176_s17  ;;  %v759_v59 = vmax.f32 %v676_v25, %v743_v56  ;;  %v760_v12 = vmax.f32 %v677_v26, %v744_v57 }
 0x27d   : > { %v2010_v17 = vunpack.i.h.bf16 %v2008_v58  ;;  %v2009_v60 = vunpack.i.l.bf16 %v2008_v58 }
 0x27e   : > { %v2021_v16 = vpack.i.bf16 %v759_v59, %v760_v12 }
 0x27f   : > { %v745_v18 = vsel %vm466_vm7, %v2010_v17, %v2009_v60  ;;  %v746_v61 = vsel %vm466_vm7, %v2009_v60, %v1995_v37  ;;  %vm2774_vm7 = vmmov %vm2772_vm3 }
 0x280   : > { %2022 = vrot.lane.b32.xlu0 %v2021_v16, %s2176_s17  ;;  %v761_v62 = vmax.f32 %v678_v36, %v745_v18  ;;  %v762_v63 = vmax.f32 %v679_v41, %v746_v61 }
 0x282   : > { %v2026_v20 = vpack.i.bf16 %v761_v62, %v762_v63 }
 0x284   : > { %2027 = vrot.lane.b32.xlu1 %v2026_v20, %s2176_s17  ;;  %v903_v20 = vld [vmem:[%s2755_s4 + $0x10] sm:$0xff] }
 0x2e8   : > { %v775_v0 = vpop.permute.xlu0 %774 }
 0x2ea   : > { %v2013_v23 = vpop.permute.xlu1 %2012 }
 0x2eb   : > { %v2015_v25 = vunpack.i.h.bf16 %v2013_v23  ;;  %v2014_v26 = vunpack.i.l.bf16 %v2013_v23  ;;  %v907_v23 = vld [vmem:[%s2756_s5] sm:$0xff] }
 0x2ed   : > { %v792_v1 = vsel %vm2772_vm3, %v775_v0, %v2014_v26  ;;  %v793_v47 = vsel %vm2773_vm4, %v2014_v26, %v2015_v25  ;;  %v938_v26 = vand.u32 7, %v2300_v33  ;;  %vm1373_vm3 = vcmask 171008  }
 0x2ee   : > { %v808_v49 = vmax.f32 %v755_v46, %v792_v1  ;;  %v2018_v2 = vpop.permute.xlu1 %2017  ;;  %v809_v3 = vmax.f32 %v756_v45, %v793_v47 }
 0x2ef   : > { %v2020_v4 = vunpack.i.h.bf16 %v2018_v2  ;;  %v2019_v28 = vunpack.i.l.bf16 %v2018_v2  ;;  %vm946_vm1 = vcmp.ge.s32.totalorder %v938_v26, 1  ;;  %vm953_vm6 = vcmp.le.s32.totalorder %v938_v26, 6  ;;  %v904_v2 = vld [vmem:[%s2755_s4 + $0x18] sm:$0xff] }
 0x2f0   : > { %880 = vmatprep.mubr.f32.mxu1 %v809_v3  ;;  %vm2617_vm5 = vmpackc.low %vm946_vm1, %vm946_vm1 }
 0x2f1   : > { %881 = vmatmul.mubr.f32.vlgmr.msra.gmra.mrb[8].mxu1 %v808_v49  ;;  %v795_v31 = vsel %vm2774_vm7, %v2019_v28, %v2015_v25  ;;  %v794_v36 = vsel %vm2775_vm9, %v2020_v4, %v2019_v28  ;;  %vm2623_vm2 = vmpackc.low %vm953_vm6, %vm953_vm6  ;;  %vm1461_vm9 = vcmask 130048  }
 0x2f2   : > { %v2023_v41 = vpop.permute.xlu0 %2022  ;;  %v811_v6 = vmax.f32 %v758_v5, %v795_v31  ;;  %v810_v8 = vmax.f32 %v757_v55, %v794_v36 }
 0x2f3   : > { %v2025_v11 = vunpack.i.h.bf16 %v2023_v41  ;;  %v2024_v13 = vunpack.i.l.bf16 %v2023_v41 }
 0x2f4   : > { %885 = vmatprep.mubr.f32.mxu1 %v811_v6 }
 0x2f5   : > { %886 = vmatmul.mubr.f32.gmra.mrb[10].mxu1 %v810_v8  ;;  %v797_v14 = vsel %vm2776_vm11, %v2024_v13, %v2015_v25  ;;  %v796_v15 = vsel %vm2777_vm12, %v2025_v11, %v2024_v13  ;;  %v1245_v13 = vld [vmem:[%s2757_s6] sm:$0xff] }
 0x2f6   : > { %v2028_v19 = vpop.permute.xlu1 %2027  ;;  %v813_v21 = vmax.f32 %v760_v12, %v797_v14  ;;  %v812_v22 = vmax.f32 %v759_v59, %v796_v15 }
 0x2f7   : > { %v2030_v24 = vunpack.i.h.bf16 %v2028_v19  ;;  %v2029_v27 = vunpack.i.l.bf16 %v2028_v19 }
 0x2f8   : > { %890 = vmatprep.mubr.f32.mxu1 %v813_v21 }
 0x2f9   : > { %891 = vmatmul.mubr.f32.gmra.mrb[12].mxu1 %v812_v22  ;;  %v799_v29 = vsel %vm2778_vm13, %v2029_v27, %v2015_v25  ;;  %v798_v30 = vsel %vm2779_vm14, %v2030_v24, %v2029_v27  ;;  %v908_v25 = vld [vmem:[%s2756_s5 + $0x8] sm:$0xff] }
 0x2fa   : > { %v815_v32 = vmax.f32 %v762_v63, %v799_v29  ;;  %v814_v34 = vmax.f32 %v761_v62, %v798_v30  ;;  %v902_v63 = vld [vmem:[%s2755_s4 + $0x8] sm:$0xff] }
 0x2fb   : > { %1157 = vmatprep.mubr.f32.mxu0 %v902_v63 }
 0x2fc   : > { %895 = vmatprep.mubr.f32.mxu1 %v815_v32 }
 0x2fd   : > { %896 = vmatmul.mubr.f32.gmra.mrb[14].mxu1 %v814_v34 }
 0x2fe   : > { %1752 = vmatprep.mubr.msk.f32.mxu1 %vm1086_vm0, %v903_v20 }
 0x3c4   : > { %v1678_v35 = vpop.f32.mrb[8].mxu1 }
 0x3c5   : > { %v1679_v37 = vpop.f32.mrb[9].mxu1 }
 0x3c6   : > { %v1680_v38 = vadd.f32 %v1679_v37, %v1678_v35 }
 0x3c8   : > { %v1681_v39 = vpop.f32.mrb[10].mxu1 }
 0x3c9   : > { %v1682_v40 = vpop.f32.mrb[11].mxu1 }
 0x3ca   : > { %v1683_v42 = vadd.f32 %v1682_v40, %v1681_v39 }
 0x3cc   : > { %v2031_v43 = vpack.i.bf16 %v1683_v42, %v1680_v38  ;;  %v1684_v44 = vpop.f32.mrb[12].mxu1 }
 0x3cd   : > { %v1685_v46 = vpop.f32.mrb[13].mxu1 }
 0x3ce   : > { %v1686_v45 = vadd.f32 %v1685_v46, %v1684_v44  ;;  %2032 = vrot.lane.b32.xlu0 %v2031_v43, %s2186_s15 }
 0x3d0   : > { %v1687_v48 = vpop.f32.mrb[14].mxu1 }
 0x3d1   : > { %v1688_v50 = vpop.f32.mrb[15].mxu1 }
 0x3d2   : > { %v1689_v51 = vadd.f32 %v1688_v50, %v1687_v48 }
 0x3d4   : > { %v2036_v52 = vpack.i.bf16 %v1689_v51, %v1686_v45 }
 0x3d6   : > { %2037 = vrot.lane.b32.xlu1 %v2036_v52, %s2186_s15 }
 0x440   : > { %v2033_v53 = vpop.permute.xlu0 %2032 }
 0x441   : > { %v2035_v54 = vunpack.i.h.bf16 %v2033_v53  ;;  %v2034_v55 = vunpack.i.l.bf16 %v2033_v53 }
 0x443   : > { %v926_v5 = vsel %vm564_vm10, 0.0, %v2035_v54  ;;  %v925_v7 = vsel %vm564_vm10, 0.0, %v2034_v55 }
 0x444   : > { %v931_v9 = vsel %vm929_vm15, %v926_v5, 0.0  ;;  %v930_v10 = vsel %vm929_vm15, %v925_v7, 0.0 }
 0x445   : > { %v2041_v56 = vpack.i.bf16 %v931_v9, %v930_v10  ;;  %v1814_v57 = vpack.c.bf16 %v931_v9, %v930_v10 }
 0x447   : > { %2042 = vrot.lane.b32.xlu0 %v2041_v56, %s2187_s18 }
 0x448   : > { %v2038_v58 = vpop.permute.xlu1 %2037 }
 0x449   : > { %v2040_v59 = vunpack.i.h.bf16 %v2038_v58  ;;  %v2039_v12 = vunpack.i.l.bf16 %v2038_v58 }
 0x44b   : > { %v928_v17 = vsel %vm564_vm10, 0.0, %v2040_v59  ;;  %v927_v60 = vsel %vm564_vm10, 0.0, %v2039_v12  ;;  %2052 = vrot.lane.b32.xlu0 %v2041_v56, %s2188_s20  ;;  %vm1370_vm10 = vcmask 39936  }
 0x44c   : > { %v933_v16 = vsel %vm929_vm15, %v928_v17, 0.0  ;;  %v932_v18 = vsel %vm929_vm15, %v927_v60, 0.0 }
 0x44d   : > { %v2061_v61 = vpack.i.bf16 %v933_v16, %v932_v18  ;;  %v1819_v62 = vpack.c.bf16 %v933_v16, %v932_v18 }
 0x44f   : > { %2062 = vrot.lane.b32.xlu0 %v2061_v61, %s2188_s20  ;;  %2047 = vrot.lane.b32.xlu1 %v2061_v61, %s2187_s18 }
 0x453   : > { %2067 = vrot.lane.b32.xlu0 %v2041_v56, %s2176_s17  ;;  %2057 = vrot.lane.b32.xlu1 %v2041_v56, %s2180_s21 }
 0x457   : > { %2082 = vrot.lane.b32.xlu0 %v2061_v61, %s2176_s17  ;;  %2072 = vrot.lane.b32.xlu1 %v2061_v61, %s2180_s21 }
 0x45b   : > { %2087 = vrot.lane.b32.xlu0 %v2041_v56, %s2181_s22  ;;  %2077 = vrot.lane.b32.xlu1 %v2041_v56, %s2175_s16 }
 0x45f   : > { %2102 = vrot.lane.b32.xlu0 %v2061_v61, %s2181_s22  ;;  %2092 = vrot.lane.b32.xlu1 %v2061_v61, %s2175_s16  ;;  %s2193_s22 = smov 124  }
 0x463   : > { %2112 = vrot.lane.b32.xlu0 %v2041_v56, %s2178_s19  ;;  %2097 = vrot.lane.b32.xlu1 %v2041_v56, %s2189_s25 }
 0x467   : > { %1078 = vperm.xlu0 %1990, %v907_v23   ;;  %2107 = vrot.lane.b32.xlu1 %v2061_v61, %s2189_s25 }
 0x46b   : > { %2117 = vrot.lane.b32.xlu1 %v2061_v61, %s2178_s19 }
 0x46f   : > { %1083 = vperm.xlu1 %1989, %v908_v25  }
 0x4b9   : > { %v2043_v0 = vpop.permute.xlu0 %2042 }
 0x4ba   : > { %v2045_v1 = vunpack.i.h.bf16 %v2043_v0  ;;  %v2044_v47 = vunpack.i.l.bf16 %v2043_v0 }
 0x4bc   : > { %v1812_v49 = vpack.c.bf16 %v2045_v1, %v2044_v47  ;;  %v901_v47 = vld [vmem:[%s2755_s4] sm:$0xff] }
 0x4bd   : > { %v2053_v3 = vpop.permute.xlu0 %2052 }
 0x4be   : > { %1813 = vmatprep.subr.bf16.mxu0 %v1812_v49  ;;  %v2055_v4 = vunpack.i.h.bf16 %v2053_v3  ;;  %v2054_v28 = vunpack.i.l.bf16 %v2053_v3  ;;  %v905_v3 = vld [vmem:[%s2755_s4 + $0x20] sm:$0xff] }
 0x4bf   : > { %1816 = vmatpush3.bf16.msk.msra.mxu0 %vm2617_vm5, %v1814_v57 }
 0x4c0   : > { %v1822_v11 = vpack.c.bf16 %v2055_v4, %v2054_v28  ;;  %v906_v4 = vld [vmem:[%s2755_s4 + $0x28] sm:$0xff] }
 0x4c1   : > { %v2063_v31 = vpop.permute.xlu0 %2062  ;;  %v2048_v36 = vpop.permute.xlu1 %2047 }
 0x4c2   : > { %v2050_v41 = vunpack.i.h.bf16 %v2048_v36  ;;  %v2049_v6 = vunpack.i.l.bf16 %v2048_v36  ;;  %v2065_v19 = vunpack.i.h.bf16 %v2063_v31  ;;  %v2064_v21 = vunpack.i.l.bf16 %v2063_v31 }
 0x4c4   : > { %v1817_v8 = vpack.c.bf16 %v2050_v41, %v2049_v6  ;;  %v1827_v35 = vpack.c.bf16 %v2065_v19, %v2064_v21 }
 0x4c5   : > { %v2068_v14 = vpop.permute.xlu0 %2067  ;;  %v2058_v15 = vpop.permute.xlu1 %2057 }
 0x4c6   : > { %v2060_v22 = vunpack.i.h.bf16 %v2058_v15  ;;  %v2059_v24 = vunpack.i.l.bf16 %v2058_v15  ;;  %1818 = vmatprep.subr.bf16.mxu0 %v1817_v8  ;;  %v2070_v29 = vunpack.i.h.bf16 %v2068_v14  ;;  %v2069_v30 = vunpack.i.l.bf16 %v2068_v14  ;;  %v1246_v14 = vld [vmem:[%s2757_s6 + $0x8] sm:$0xff]  ;;  %v1247_v15 = vld [vmem:[%s2757_s6 + $0x10] sm:$0xff] }
 0x4c7   : > { %1821 = vmatpush3.bf16.msk.msra.mxu0 %vm2617_vm5, %v1819_v62 }
 0x4c8   : > { %v1825_v27 = vpack.c.bf16 %v2060_v22, %v2059_v24  ;;  %1824 = vmatprep.subr.msk.bf16.mxu0 %vm2623_vm2, %v1822_v11  ;;  %v1832_v40 = vpack.c.bf16 %v2070_v29, %v2069_v30  ;;  %v1866_v22 = vpack.c.bf16 %v1246_v14, %v1245_v13  ;;  %v1248_v24 = vld [vmem:[%s2757_s6 + $0x18] sm:$0xff] }
 0x4c9   : > { %v2083_v32 = vpop.permute.xlu0 %2082  ;;  %v2073_v34 = vpop.permute.xlu1 %2072  ;;  %v1870_v30 = vpack.c.bf16 %v1248_v24, %v1247_v15 }
 0x4ca   : > { %v2075_v37 = vunpack.i.h.bf16 %v2073_v34  ;;  %v2074_v38 = vunpack.i.l.bf16 %v2073_v34  ;;  %v2085_v44 = vunpack.i.h.bf16 %v2083_v32  ;;  %v2084_v46 = vunpack.i.l.bf16 %v2083_v32  ;;  %v1249_v32 = vld [vmem:[%s2757_s6 + $0x20] sm:$0xff]  ;;  %v1250_v34 = vld [vmem:[%s2757_s6 + $0x28] sm:$0xff] }
 0x4cb   : > { %1826 = vmatpush3.bf16.msra.mxu0 %v1825_v27 }
 0x4cc   : > { %v1830_v39 = vpack.c.bf16 %v2075_v37, %v2074_v38  ;;  %1829 = vmatprep.subr.msk.bf16.mxu0 %vm2623_vm2, %v1827_v35  ;;  %v1838_v55 = vpack.c.bf16 %v2085_v44, %v2084_v46  ;;  %v1251_v46 = vld [vmem:[%s2757_s6 + $0x30] sm:$0xff] }
 0x4cd   : > { %v2088_v42 = vpop.permute.xlu0 %2087  ;;  %v2078_v43 = vpop.permute.xlu1 %2077 }
 0x4ce   : > { %v2080_v45 = vunpack.i.h.bf16 %v2078_v43  ;;  %v2079_v48 = vunpack.i.l.bf16 %v2078_v43  ;;  %v2090_v51 = vunpack.i.h.bf16 %v2088_v42  ;;  %v2089_v52 = vunpack.i.l.bf16 %v2088_v42 }
 0x4cf   : > { %1831 = vmatpush3.bf16.msra.mxu0 %v1830_v39  ;;  %v1874_v39 = vpack.c.bf16 %v1250_v34, %v1249_v32 }
 0x4d0   : > { %v1835_v50 = vpack.c.bf16 %v2080_v45, %v2079_v48  ;;  %1834 = vmatprep.subr.msk.bf16.mxu0 %vm2617_vm5, %v1832_v40  ;;  %v1844_v10 = vpack.c.bf16 %v2090_v51, %v2089_v52  ;;  %v1252_v45 = vld [vmem:[%s2757_s6 + $0x38] sm:$0xff] }
 0x4d1   : > { %v2103_v53 = vpop.permute.xlu0 %2102  ;;  %v2093_v54 = vpop.permute.xlu1 %2092  ;;  %v1878_v48 = vpack.c.bf16 %v1252_v45, %v1251_v46 }
 0x4d2   : > { %v2095_v5 = vunpack.i.h.bf16 %v2093_v54  ;;  %v2094_v7 = vunpack.i.l.bf16 %v2093_v54  ;;  %v2105_v56 = vunpack.i.h.bf16 %v2103_v53  ;;  %v2104_v57 = vunpack.i.l.bf16 %v2103_v53 }
 0x4d3   : > { %1837 = vmatpush3.bf16.msk.msra.mxu0 %vm2623_vm2, %v1835_v50 }
 0x4d4   : > { %v1841_v9 = vpack.c.bf16 %v2095_v5, %v2094_v7  ;;  %1840 = vmatprep.subr.msk.bf16.mxu0 %vm2617_vm5, %v1838_v55  ;;  %v1849_v63 = vpack.c.bf16 %v2105_v56, %v2104_v57  ;;  %v2190_v56 = vmov 0.0|0.0  }
 0x4d5   : > { %v2113_v58 = vpop.permute.xlu0 %2112  ;;  %v2098_v59 = vpop.permute.xlu1 %2097 }
 0x4d6   : > { %v2115_v12 = vunpack.i.h.bf16 %v2113_v58  ;;  %v2114_v17 = vunpack.i.l.bf16 %v2113_v58  ;;  %v2100_v60 = vunpack.i.h.bf16 %v2098_v59  ;;  %v2099_v16 = vunpack.i.l.bf16 %v2098_v59 }
 0x4d7   : > { %1843 = vmatpush3.bf16.msk.msra.mxu0 %vm2623_vm2, %v1841_v9 }
 0x4d8   : > { %v1854_v18 = vpack.c.bf16 %v2115_v12, %v2114_v17  ;;  %v1846_v61 = vpack.c.bf16 %v2100_v60, %v2099_v16  ;;  %1845 = vmatprep.subr.bf16.mxu0 %v1844_v10  ;;  %v1380_v12 = vand.u32 3, %v2300_v33  ;;  %v1361_v33 = vld [vmem:[%s2759_s8] sm:$0xff] }
 0x4d9   : > { %v2108_v62 = vpop.permute.xlu1 %2107 }
 0x4da   : > { %v2110_v20 = vunpack.i.h.bf16 %v2108_v62  ;;  %v2109_v23 = vunpack.i.l.bf16 %v2108_v62  ;;  %1856 = vmatprep.subr.msk.bf16.mxu1 %vm2623_vm2, %v1854_v18  ;;  %vm1388_vm4 = vcmp.ge.s32.totalorder %v1380_v12, 1  ;;  %vm1393_vm11 = vcmp.le.s32.totalorder %v1380_v12, 2 }
 0x4db   : > { %1848 = vmatpush3.bf16.msk.msra.mxu0 %vm2617_vm5, %v1846_v61  ;;  %1859 = vmatpush3.bf16.msk.msra.mxu1 %vm2623_vm2, %v1854_v18  ;;  %vm2700_vm7 = vmpackc.low %vm1388_vm4, %vm1388_vm4 }
 0x4dc   : > { %v1851_v25 = vpack.c.bf16 %v2110_v20, %v2109_v23  ;;  %1850 = vmatprep.subr.bf16.mxu0 %v1849_v63  ;;  %vm2720_vm12 = vmpackc.low %vm1393_vm11, %vm1393_vm11 }
 0x4dd   : > { %v2118_v26 = vpop.permute.xlu1 %2117 }
 0x4de   : > { %v2120_v0 = vunpack.i.h.bf16 %v2118_v26  ;;  %v2119_v1 = vunpack.i.l.bf16 %v2118_v26  ;;  %v1360_v26 = vld [vmem:[%s2758_s7 + $0x8] sm:$0xff] }
 0x4df   : > { %1853 = vmatpush3.bf16.msk.msra.mxu0 %vm2617_vm5, %v1851_v25 }
 0x4e0   : > { %v1860_v49 = vpack.c.bf16 %v2120_v0, %v2119_v1  ;;  %1882 = vmatprep.subr.bf16.mxu0 %v2190_v56 }
 0x4e2   : > { %1158 = vmatmul.mubr.f32.vlgmr.msra.gmra.mrb[0].mxu0 %v901_v47  ;;  %1862 = vmatprep.subr.msk.bf16.mxu1 %vm2623_vm2, %v1860_v49 }
 0x4e3   : > { %1865 = vmatpush3.bf16.msk.msra.mxu1 %vm2623_vm2, %v1860_v49  ;;  %1162 = vmatprep.mubr.f32.mxu0 %v905_v3 }
 0x4e4   : > { %1867 = vmatprep.subr.bf16.mxu1 %v1866_v22 }
 0x4e6   : > { %1163 = vmatmul.mubr.f32.gmra.mrb[2].mxu0 %v904_v2  ;;  %1753 = vmatmul.mubr.msk.f32.vlgmr.msra.gmra.mrb[16].mxu1 %vm1086_vm0, %v906_v4  ;;  %v1079_v41 = vpop.permute.xlu0 %1078 }
 0x4e7   : > { %1869 = vmatpush3.bf16.msra.mxu1 %v1866_v22  ;;  %1643 = vmatprep.mubr.msk.f32.mxu0 %vm1461_vm9, %v1360_v26 }
 0x4e8   : > { %1871 = vmatprep.subr.bf16.mxu1 %v1870_v30 }
 0x4eb   : > { %1873 = vmatpush3.bf16.msra.mxu1 %v1870_v30 }
 0x4ec   : > { %1875 = vmatprep.subr.bf16.mxu1 %v1874_v39 }
 0x4ee   : > { %v1084_v35 = vpop.permute.xlu1 %1083 }
 0x4ef   : > { %1877 = vmatpush3.bf16.msra.mxu1 %v1874_v39 }
 0x4f0   : > { %1879 = vmatprep.subr.bf16.mxu1 %v1878_v48 }
 0x4f3   : > { %1881 = vmatpush3.bf16.msra.mxu1 %v1878_v48 }
 0x5b5   : > { %v1722_v28 = vpop.f32.mrb[0].mxu0 }
 0x5b6   : > { %v1723_v31 = vpop.f32.mrb[1].mxu0 }
 0x5b7   : > { %v1724_v36 = vadd.f32 %v1723_v31, %v1722_v28 }
 0x5b9   : > { %v1725_v6 = vpop.f32.mrb[2].mxu0  ;;  %v1754_v8 = vpop.f32.mrb[16].mxu1  ;;  %v1160_v11 = vadd.f32 %v1724_v36, %v1079_v41 }
 0x5ba   : > { %v1726_v19 = vpop.f32.mrb[3].mxu0  ;;  %v1234_v21 = vpop.f32.mrb[17].mxu1 }
 0x5bb   : > { %v1727_v27 = vadd.f32 %v1726_v19, %v1725_v6  ;;  %v1235_v29 = vadd.f32 %v1234_v21, %v1160_v11 }
 0x5bd   : > { %v1165_v37 = vadd.f32 %v1727_v27, %v1084_v35  ;;  %v1243_v38 = vmax.f32 %v1235_v29, 0.0 }
 0x5bf   : > { %v1254_v40 = vsel %vm1253_vm8, %v1243_v38, 0.0  ;;  %v1240_v42 = vadd.f32 %v1754_v8, %v1165_v37 }
 0x5c0   : > { %1258 = vrot.lane.b32.xlu0 %v1254_v40, %s2180_s21 }
 0x5c1   : > { %v1244_v43 = vmax.f32 %v1240_v42, 0.0 }
 0x5c3   : > { %v1255_v44 = vsel %vm1253_vm8, %v1244_v43, 0.0 }
 0x5c4   : > { %1260 = vrot.lane.b32.xlu1 %v1255_v44, %s2180_s21 }
 0x632   : > { %v1259_v50 = vpop.permute.xlu0 %1258 }
 0x633   : > { %v1266_v51 = vmax.f32 %v1254_v40, %v1259_v50  ;;  %v1264_v54 = vmax.f32 %v1243_v38, %v1259_v50 }
 0x635   : > { %1270 = vrot.lane.b32.xlu0 %v1266_v51, %s2189_s25 }
 0x636   : > { %v1261_v52 = vpop.permute.xlu1 %1260 }
 0x637   : > { %v1267_v53 = vmax.f32 %v1255_v44, %v1261_v52  ;;  %v1265_v7 = vmax.f32 %v1244_v43, %v1261_v52  ;;  %v1359_v44 = vld [vmem:[%s2758_s7] sm:$0xff] }
 0x639   : > { %1272 = vrot.lane.b32.xlu1 %v1267_v53, %s2189_s25 }
 0x6a7   : > { %v1271_v55 = vpop.permute.xlu0 %1270 }
 0x6a8   : > { %v1276_v5 = vmax.f32 %v1264_v54, %v1271_v55 }
 0x6aa   : > { %1771 = vmatprep.mubr.msk.f32.mxu1 %vm1253_vm8, %v1276_v5 }
 0x6ab   : > { %v1273_v9 = vpop.permute.xlu1 %1272 }
 0x6ac   : > { %v1277_v10 = vmax.f32 %v1265_v7, %v1273_v9 }
 0x6ae   : > { %1772 = vmatmul.mubr.msk.f32.vlgmr.msra.gmra.mrb[18].mxu1 %vm1253_vm8, %v1277_v10 }
 0x781   : > { %v1773_v57 = vpop.f32.mrb[18].mxu1 }
 0x782   : > { %v1350_v58 = vpop.f32.mrb[19].mxu1 }
 0x783   : > { %v2121_v59 = vpack.i.bf16 %v1773_v57, %v1350_v58 }
 0x785   : > { %2122 = vrot.lane.b32.xlu0 %v2121_v59, %s2191_s27 }
 0x7f7   : > { %v2123_v17 = vpop.permute.xlu0 %2122 }
 0x7f8   : > { %v2125_v60 = vunpack.i.h.bf16 %v2123_v17  ;;  %v2124_v16 = vunpack.i.l.bf16 %v2123_v17 }
 0x7fa   : > { %v1372_v18 = vsel %vm1370_vm10, 0.0, %v2125_v60  ;;  %v1371_v61 = vsel %vm1370_vm10, 0.0, %v2124_v16 }
 0x7fb   : > { %v1375_v62 = vsel %vm1373_vm3, %v1372_v18, 0.0  ;;  %v1374_v63 = vsel %vm1373_vm3, %v1371_v61, 0.0 }
 0x7fc   : > { %v2131_v20 = vpack.i.bf16 %v1375_v62, %v1374_v63  ;;  %v1883_v23 = vpack.c.bf16 %v1375_v62, %v1374_v63 }
 0x7fe   : > { %2132 = vrot.lane.b32.xlu0 %v2131_v20, %s2175_s16  ;;  %2127 = vrot.lane.b32.xlu1 %v2131_v20, %s2180_s21 }
 0x7ff   : > { %1885 = vmatpush1.bf16.msk.msra.mxu0 %vm2700_vm7, %v1883_v23 }
 0x800   : > { %1886 = vmatprep.subr.bf16.mxu0 %v2190_v56 }
 0x802   : > { %2142 = vrot.lane.b32.xlu0 %v2131_v20, %s2192_s28  ;;  %2137 = vrot.lane.b32.xlu1 %v2131_v20, %s2193_s22 }
 0x806   : > { %2152 = vrot.lane.b32.xlu0 %v2131_v20, %s2189_s25  ;;  %2147 = vrot.lane.b32.xlu1 %v2131_v20, %s2194_s29  ;;  %s1596_s25 = sshll.u32 %s2789_s10, 3 }
 0x807   : > { %s327_s14 = scalar_lea.vmem %s2760_s9, %s1596_s25 }
 0x80a   : > { %2162 = vrot.lane.b32.xlu0 %v2131_v20, %s2188_s20  ;;  %2157 = vrot.lane.b32.xlu1 %v2131_v20, %s2187_s18 }
 0x80e   : > { %1458 = vperm.xlu1 %1989, %v1361_v33  }
 0x870   : > { %v2133_v0 = vpop.permute.xlu0 %2132  ;;  %v2128_v1 = vpop.permute.xlu1 %2127 }
 0x871   : > { %v2130_v47 = vunpack.i.h.bf16 %v2128_v1  ;;  %v2129_v49 = vunpack.i.l.bf16 %v2128_v1  ;;  %v2135_v3 = vunpack.i.h.bf16 %v2133_v0  ;;  %v2134_v2 = vunpack.i.l.bf16 %v2133_v0 }
 0x873   : > { %v1887_v4 = vpack.c.bf16 %v2130_v47, %v2129_v49  ;;  %v1890_v36 = vpack.c.bf16 %v2135_v3, %v2134_v2 }
 0x874   : > { %v2138_v28 = vpop.permute.xlu1 %2137  ;;  %v2143_v8 = vpop.permute.xlu0 %2142 }
 0x875   : > { %1888 = vmatpush1.bf16.msra.mxu0 %v1887_v4  ;;  %v2140_v41 = vunpack.i.h.bf16 %v2138_v28  ;;  %v2139_v6 = vunpack.i.l.bf16 %v2138_v28  ;;  %v2145_v11 = vunpack.i.h.bf16 %v2143_v8  ;;  %v2144_v13 = vunpack.i.l.bf16 %v2143_v8 }
 0x876   : > { %1889 = vmatprep.subr.bf16.mxu0 %v2190_v56 }
 0x877   : > { %v1894_v14 = vpack.c.bf16 %v2140_v41, %v2139_v6  ;;  %v1898_v19 = vpack.c.bf16 %v2145_v11, %v2144_v13 }
 0x878   : > { %v2148_v15 = vpop.permute.xlu1 %2147  ;;  %v2153_v24 = vpop.permute.xlu0 %2152 }
 0x879   : > { %1892 = vmatpush1.bf16.msk.msra.mxu0 %vm2720_vm12, %v1890_v36  ;;  %v2150_v21 = vunpack.i.h.bf16 %v2148_v15  ;;  %v2149_v22 = vunpack.i.l.bf16 %v2148_v15  ;;  %v2155_v27 = vunpack.i.h.bf16 %v2153_v24  ;;  %v2154_v29 = vunpack.i.l.bf16 %v2153_v24 }
 0x87a   : > { %1893 = vmatprep.subr.bf16.mxu0 %v2190_v56 }
 0x87b   : > { %v1901_v30 = vpack.c.bf16 %v2150_v21, %v2149_v22  ;;  %v1905_v34 = vpack.c.bf16 %v2155_v27, %v2154_v29 }
 0x87c   : > { %v2158_v32 = vpop.permute.xlu1 %2157  ;;  %v2163_v38 = vpop.permute.xlu0 %2162 }
 0x87d   : > { %1896 = vmatpush1.bf16.msk.msra.mxu0 %vm2700_vm7, %v1894_v14  ;;  %v2160_v35 = vunpack.i.h.bf16 %v2158_v32  ;;  %v2159_v37 = vunpack.i.l.bf16 %v2158_v32  ;;  %v2165_v39 = vunpack.i.h.bf16 %v2163_v38  ;;  %v2164_v40 = vunpack.i.l.bf16 %v2163_v38 }
 0x87e   : > { %1897 = vmatprep.subr.bf16.mxu0 %v2190_v56 }
 0x87f   : > { %v1909_v42 = vpack.c.bf16 %v2160_v35, %v2159_v37  ;;  %v1912_v43 = vpack.c.bf16 %v2165_v39, %v2164_v40 }
 0x881   : > { %1899 = vmatpush1.bf16.msra.mxu0 %v1898_v19 }
 0x882   : > { %1900 = vmatprep.subr.bf16.mxu0 %v2190_v56 }
 0x885   : > { %1903 = vmatpush1.bf16.msk.msra.mxu0 %vm2720_vm12, %v1901_v30 }
 0x886   : > { %1904 = vmatprep.subr.bf16.mxu0 %v2190_v56 }
 0x889   : > { %1907 = vmatpush1.bf16.msk.msra.mxu0 %vm2700_vm7, %v1905_v34 }
 0x88a   : > { %1908 = vmatprep.subr.bf16.mxu0 %v2190_v56 }
 0x88d   : > { %1910 = vmatpush1.bf16.msra.mxu0 %v1909_v42  ;;  %v1459_v46 = vpop.permute.xlu1 %1458 }
 0x88e   : > { %1911 = vmatprep.subr.bf16.mxu0 %v2190_v56 }
 0x891   : > { %1914 = vmatpush1.bf16.msk.msra.mxu0 %vm2720_vm12, %v1912_v43 }
 0x894   : > { %1530 = vmatmul.mubr.f32.vlgmr.msra.gmra.mrb[4].mxu0 %v1359_v44 }
 0x967   : > { %v1531_v45 = vpop.f32.mrb[4].mxu0 }
 0x968   : > { %v1532_v48 = vadd.f32 %v1531_v45, %v1459_v46  ;;  %v1533_v50 = vpop.f32.mrb[5].mxu0 }
 0x96a   : > { %v1535_v51 = vmax.f32 %v1532_v48, 0.0 }
 0x96c   : > { %1536 = vst.msk [vmem:[%s327_s14] sm:$0xff] %vm1461_vm9, %v1535_v51 }
 0x96d PF: > { %s19_s30 = sadd.s32 1, %s2172_s30  }
 0x96e   : > { %p16_p4 = scmp.ge.s32.totalorder %s19_s30, 4  }
 0x970   :  { %18 = sbr.rel (!%p16_p4) target bundleno = 1 (0x1), region = 86 }

</bundles_post_ra>
